<compile_context>
chip_gen: v6e
topology: v6e:2x2x1
jax: 0.10.0
libtpu: 0.0.40
codegen_flags: <defaults>
</compile_context>

<pallas_src>
import functools

import jax
import jax.numpy as jnp
from jax.experimental import pallas as pl
from jax.experimental.pallas import tpu as pltpu

ROW_TILE = 256  # max rows per grid step for the 2-D (rows, features) kernels

_CPARAMS = pltpu.CompilerParams(
    dimension_semantics=("parallel",),
    vmem_limit_bytes=48 * 1024 * 1024,
)


# ----------------------------------------------------------- tiling helpers --

def _row_grid(M):
    """Row tile + number of grid steps; ragged last block is handled by Pallas."""
    tm = M if M <= ROW_TILE else ROW_TILE
    return tm, pl.cdiv(M, tm)


# ------------------------------------------------------------------ kernels --

def _layernorm_kernel(x_ref, g_ref, b_ref, o_ref):
    x = x_ref[...]
    mu = jnp.mean(x, axis=-1, keepdims=True)
    xc = x - mu
    var = jnp.mean(xc * xc, axis=-1, keepdims=True)
    o_ref[...] = xc * jax.lax.rsqrt(var + 1e-5) * g_ref[...] + b_ref[...]


def _ln_matmul_kernel(x_ref, g_ref, b_ref, w_ref, wb_ref, o_ref):
    """o = LayerNorm(x) @ w + wb  (LN in f32, matmul on bf16 operands)."""
    x = x_ref[...]
    mu = jnp.mean(x, axis=-1, keepdims=True)
    xc = x - mu
    var = jnp.mean(xc * xc, axis=-1, keepdims=True)
    xn = xc * jax.lax.rsqrt(var + 1e-5) * g_ref[...] + b_ref[...]
    o_ref[...] = jnp.dot(xn.astype(jnp.bfloat16), w_ref[...],
                         preferred_element_type=jnp.float32) + wb_ref[...]


def _linear_kernel(x_ref, w_ref, b_ref, o_ref):
    o_ref[...] = jnp.dot(x_ref[...].astype(jnp.bfloat16), w_ref[...],
                         preferred_element_type=jnp.float32) + b_ref[...]


def _mha_out_proj(q, k, v, wo_ref, bo, num_heads):
    """All heads of one batch/group, with the output projection fused.

    q: (T, P) f32 (scale already folded into the Q projection), k/v: (S, P) f32,
    wo_ref: (H, hd, D) bf16 head-major, bo: (1, D) f32.
    Returns (T, D) f32 accumulated per head — the packed (T, P) attention
    output and its lane-shuffling concat never materialize.
    """
    T, P = q.shape
    hd = P // num_heads
    D = wo_ref.shape[-1]
    acc = jnp.zeros((T, D), jnp.float32)
    # TODO(synk): head dim < 128 under-utilizes the v6e/v7x MXU; pad/pack heads
    #             (or go head-major + grid-over-heads) at production sizes.
    for h in range(num_heads):
        lo = h * hd
        qh = q[:, lo:lo + hd].astype(jnp.bfloat16)
        kh = k[:, lo:lo + hd].astype(jnp.bfloat16)
        vh = v[:, lo:lo + hd].astype(jnp.bfloat16)
        s = jax.lax.dot_general(qh, kh, (((1,), (1,)), ((), ())),
                                preferred_element_type=jnp.float32)     # (T, S)
        m = jnp.max(s, axis=-1, keepdims=True)
        p = jnp.exp(s - m)                                              # f32
        p = p * pl.reciprocal(jnp.sum(p, axis=-1, keepdims=True), approx=True)
        pv = jnp.dot(p.astype(jnp.bfloat16), vh,
                     preferred_element_type=jnp.float32)                # (T, hd)
        acc = acc + jnp.dot(pv.astype(jnp.bfloat16), wo_ref[h],
                            preferred_element_type=jnp.float32)         # (T, D)
    return acc + bo


def _cross_attn_proj_kernel(q_ref, kv_ref, wo_ref, bo_ref, o_ref, *, num_heads):
    q = q_ref[0]                                    # (T, P)
    kv = kv_ref[0]                                  # (S, 2P) packed [K|V]
    P = q.shape[-1]
    o_ref[0] = _mha_out_proj(q, kv[:, :P], kv[:, P:], wo_ref, bo_ref[...],
                             num_heads)


def _self_attn_proj_res_kernel(qkv_ref, res_ref, wo_ref, bo_ref, o_ref, *,
                               num_heads):
    qkv = qkv_ref[0]                                # (T, 3P) packed [Q|K|V]
    P = qkv.shape[-1] // 3
    attn = _mha_out_proj(qkv[:, :P], qkv[:, P:2 * P], qkv[:, 2 * P:],
                         wo_ref, bo_ref[...], num_heads)
    o_ref[0] = res_ref[0] + attn


def _conv_ffn_kernel(x_ref, inp_ref, cw_ref, cb_ref, g_ref, b_ref,
                     w1_ref, b1_ref, w2_ref, b2_ref, o_ref):
    """One sequence group: conv1d(D,D,k=3,pad=1)+ReLU, residual1, LN, FFN
    (w1 + ReLU + w2), residual2 — x_conv / inp1 never leave VMEM.

    o = inp + relu(conv(x)) + w2(relu(w1(LN(relu(conv(x))))))
    """
    x = x_ref[0]                                    # (Lg, D) f32
    D = x.shape[-1]
    zrow = jnp.zeros((1, D), jnp.float32)
    xm = jnp.concatenate([zrow, x[:-1]], axis=0).astype(jnp.bfloat16)   # x[l-1]
    xp = jnp.concatenate([x[1:], zrow], axis=0).astype(jnp.bfloat16)    # x[l+1]
    xc = x.astype(jnp.bfloat16)
    # 3 accumulating (Lg,D)x(D,D) matmuls — no (Lg,3D) concat buffer.
    y = jnp.dot(xc, cw_ref[1], preferred_element_type=jnp.float32)
    y = y + jnp.dot(xm, cw_ref[0], preferred_element_type=jnp.float32)
    y = y + jnp.dot(xp, cw_ref[2], preferred_element_type=jnp.float32)
    y = jnp.maximum(y + cb_ref[...], 0.0)           # conv output (Lg, D) f32

    res1 = inp_ref[0] + y                           # first residual

    mu = jnp.mean(y, axis=-1, keepdims=True)
    yc = y - mu
    var = jnp.mean(yc * yc, axis=-1, keepdims=True)
    yn = yc * jax.lax.rsqrt(var + 1e-5) * g_ref[...] + b_ref[...]
    # TODO(synk): tile the FFN hidden dim (second grid axis + f32 accumulator)
    #             for production D on v7x's 64 MiB VMEM.
    h = jnp.dot(yn.astype(jnp.bfloat16), w1_ref[...],
                preferred_element_type=jnp.float32) + b1_ref[...]
    h = jnp.maximum(h, 0.0)
    o_ref[0] = res1 + jnp.dot(h.astype(jnp.bfloat16), w2_ref[...],
                              preferred_element_type=jnp.float32) + b2_ref[...]


# ----------------------------------------------------------------- wrappers --

def layernorm_pallas(x2d, gamma, beta):
    M, D = x2d.shape
    tm, steps = _row_grid(M)
    return pl.pallas_call(
        _layernorm_kernel,
        out_shape=jax.ShapeDtypeStruct((M, D), jnp.float32),
        grid=(steps,),
        in_specs=[pl.BlockSpec((tm, D), lambda i: (i, 0)),
                  pl.BlockSpec((1, D), lambda i: (0, 0)),
                  pl.BlockSpec((1, D), lambda i: (0, 0))],
        out_specs=pl.BlockSpec((tm, D), lambda i: (i, 0)),
        compiler_params=_CPARAMS,
    )(x2d, gamma.reshape(1, D), beta.reshape(1, D))


def ln_linear_pallas(x2d, gamma, beta, w, wb):
    """LayerNorm(x) @ w + wb, row-tiled (w is bf16)."""
    M, D = x2d.shape
    Dout = w.shape[1]
    tm, steps = _row_grid(M)
    return pl.pallas_call(
        _ln_matmul_kernel,
        out_shape=jax.ShapeDtypeStruct((M, Dout), jnp.float32),
        grid=(steps,),
        in_specs=[pl.BlockSpec((tm, D), lambda i: (i, 0)),
                  pl.BlockSpec((1, D), lambda i: (0, 0)),
                  pl.BlockSpec((1, D), lambda i: (0, 0)),
                  pl.BlockSpec((D, Dout), lambda i: (0, 0)),
                  pl.BlockSpec((1, Dout), lambda i: (0, 0))],
        out_specs=pl.BlockSpec((tm, Dout), lambda i: (i, 0)),
        compiler_params=_CPARAMS,
    )(x2d, gamma.reshape(1, D), beta.reshape(1, D), w, wb.reshape(1, Dout))


def linear_pallas(x2d, w, b):
    """x @ w + b, row-tiled (w is bf16). Used for the fused K|V projection."""
    M, Din = x2d.shape
    Dout = w.shape[1]
    tm, steps = _row_grid(M)
    return pl.pallas_call(
        _linear_kernel,
        out_shape=jax.ShapeDtypeStruct((M, Dout), jnp.float32),
        grid=(steps,),
        in_specs=[pl.BlockSpec((tm, Din), lambda i: (i, 0)),
                  pl.BlockSpec((Din, Dout), lambda i: (0, 0)),
                  pl.BlockSpec((1, Dout), lambda i: (0, 0))],
        out_specs=pl.BlockSpec((tm, Dout), lambda i: (i, 0)),
        compiler_params=_CPARAMS,
    )(x2d, w, b.reshape(1, Dout))


def cross_attn_proj_pallas(q, kv, wo, bo, num_heads):
    """q: (B,T,P); kv: (B,S,2P) packed [K|V]; wo: (H,hd,D) bf16 head-major."""
    B, T, P = q.shape
    S = kv.shape[1]
    H, hd, D = wo.shape
    return pl.pallas_call(
        functools.partial(_cross_attn_proj_kernel, num_heads=num_heads),
        out_shape=jax.ShapeDtypeStruct((B, T, D), jnp.float32),
        grid=(B,),
        in_specs=[pl.BlockSpec((1, T, P), lambda i: (i, 0, 0)),
                  pl.BlockSpec((1, S, 2 * P), lambda i: (i, 0, 0)),
                  pl.BlockSpec((H, hd, D), lambda i: (0, 0, 0)),
                  pl.BlockSpec((1, D), lambda i: (0, 0))],
        out_specs=pl.BlockSpec((1, T, D), lambda i: (i, 0, 0)),
        compiler_params=_CPARAMS,
    )(q, kv, wo, bo.reshape(1, D))


def self_attn_proj_res_pallas(qkv, res, wo, bo, num_heads):
    """qkv: (G,T,3P) packed [Q|K|V]; res: (G,T,D); wo: (H,hd,D) bf16."""
    G, T, P3 = qkv.shape
    H, hd, D = wo.shape
    return pl.pallas_call(
        functools.partial(_self_attn_proj_res_kernel, num_heads=num_heads),
        out_shape=jax.ShapeDtypeStruct((G, T, D), jnp.float32),
        grid=(G,),
        in_specs=[pl.BlockSpec((1, T, P3), lambda i: (i, 0, 0)),
                  pl.BlockSpec((1, T, D), lambda i: (i, 0, 0)),
                  pl.BlockSpec((H, hd, D), lambda i: (0, 0, 0)),
                  pl.BlockSpec((1, D), lambda i: (0, 0))],
        out_specs=pl.BlockSpec((1, T, D), lambda i: (i, 0, 0)),
        compiler_params=_CPARAMS,
    )(qkv, res, wo, bo.reshape(1, D))


def conv_ffn_pallas(x_grp, inp_grp, cw, cb, gamma, beta, w1, b1, w2, b2):
    """Per sequence group: conv1d(k=3,pad=1)+ReLU, res1, LN, FFN, res2 fused."""
    G, Lg, D = x_grp.shape
    H = w1.shape[1]
    return pl.pallas_call(
        _conv_ffn_kernel,
        out_shape=jax.ShapeDtypeStruct((G, Lg, D), jnp.float32),
        grid=(G,),
        in_specs=[pl.BlockSpec((1, Lg, D), lambda i: (i, 0, 0)),
                  pl.BlockSpec((1, Lg, D), lambda i: (i, 0, 0)),
                  pl.BlockSpec((3, D, D), lambda i: (0, 0, 0)),
                  pl.BlockSpec((1, D), lambda i: (0, 0)),
                  pl.BlockSpec((1, D), lambda i: (0, 0)),
                  pl.BlockSpec((1, D), lambda i: (0, 0)),
                  pl.BlockSpec((D, H), lambda i: (0, 0)),
                  pl.BlockSpec((1, H), lambda i: (0, 0)),
                  pl.BlockSpec((H, D), lambda i: (0, 0)),
                  pl.BlockSpec((1, D), lambda i: (0, 0))],
        out_specs=pl.BlockSpec((1, Lg, D), lambda i: (i, 0, 0)),
        compiler_params=_CPARAMS,
    )(x_grp, inp_grp, cw, cb.reshape(1, D), gamma.reshape(1, D),
      beta.reshape(1, D), w1, b1.reshape(1, H), w2, b2.reshape(1, D))


# ------------------------------------------------------------- model (glue) --

def decoder_block_forward(p, inp, enc, N, num_heads):
    B, L, D = inp.shape
    S, d_kv = enc.shape[1], enc.shape[2]
    Lg = L // N
    P = p['cross']['wq'].shape[1]            # cross-attn d_proj (== D)
    Ps = p['self']['wqkv'].shape[1] // 3     # self-attn d_proj (== D // 4)

    inp2d = inp.reshape(B * L, D)

    # ---- cross attention: LN + Q proj fused (scale folded into wq);
    #      fused K|V proj; per-batch MHA with fused output projection ----
    q = ln_linear_pallas(inp2d, *p['ln_cross'], p['cross']['wq'], p['cross']['bq'])
    kv = linear_pallas(enc.reshape(B * S, d_kv), p['cross']['wkv'], p['cross']['bkv'])
    x = cross_attn_proj_pallas(q.reshape(B, L, P), kv.reshape(B, S, 2 * P),
                               p['cross']['wo'], p['cross']['bo'], num_heads)

    # ---- conv1d(k=3,pad=1)+ReLU + residual1 + LN + FFN + residual2, fused ----
    inp2 = conv_ffn_pallas(x.reshape(B * N, Lg, D), inp.reshape(B * N, Lg, D),
                           p['conv_w'], p['conv_b'], *p['ln_ffn'],
                           p['ffn_w1'], p['ffn_b1'], p['ffn_w2'], p['ffn_b2'])

    # ---- grouped self attention: LN + fused QKV proj (scale folded);
    #      per-group MHA with fused output projection + residual ----
    qkv = ln_linear_pallas(inp2.reshape(B * L, D), *p['ln_self'],
                           p['self']['wqkv'], p['self']['bqkv'])
    out = self_attn_proj_res_pallas(qkv.reshape(B * N, Lg, 3 * Ps),
                                    inp2, p['self']['wo'], p['self']['bo'],
                                    num_heads)
    return out.reshape(B, L, D)


def transformer_decoder_forward(params, inp, enc, pos_emb, Nr, num_heads):
    del pos_emb  # unused by the reference forward
    for blk in params['blocks']:
        inp = decoder_block_forward(blk, inp, enc, Nr, num_heads)
    B, L, D = inp.shape
    return layernorm_pallas(inp.reshape(B * L, D),
                            *params['ln_final']).reshape(B, L, D)


# ------------------------------------------------------------------- params --

def _xavier(key, shape, gain=1.0):
    fan_in, fan_out = shape
    a = gain * (6.0 / (fan_in + fan_out)) ** 0.5
    return jax.random.uniform(key, shape, jnp.float32, -a, a)


def _kaiming(key, shape):
    fan_in = shape[0]
    a = (6.0 / fan_in) ** 0.5
    return jax.random.uniform(key, shape, jnp.float32, -a, a)


def init_params(key, num_blocks, d_q, d_kv, num_heads):
    gain = (3 * num_blocks) ** -0.5
    dps = d_q // 4
    assert d_q % num_heads == 0 and dps % num_heads == 0
    hd_c = d_q // num_heads
    hd_s = dps // num_heads
    sc_c = float(hd_c) ** -0.5       # attention scale, folded into Q projection
    sc_s = float(hd_s) ** -0.5
    bf16 = jnp.bfloat16
    blocks = []
    keys = jax.random.split(key, num_blocks)
    for bi in range(num_blocks):
        ks = jax.random.split(keys[bi], 16)
        conv_bound = 1.0 / (d_q * 3) ** 0.5
        blk = {
            'ln_cross': (jnp.ones(d_q, jnp.float32), jnp.zeros(d_q, jnp.float32)),
            'cross': {
                # 1/sqrt(hd) folded into the Q projection weight (bias is zero)
                'wq': (_xavier(ks[0], (d_q, d_q)) * sc_c).astype(bf16),
                'bq': jnp.zeros(d_q, jnp.float32),
                # fused K|V projection weight: (d_kv, 2*d_q)
                'wkv': jnp.concatenate([_xavier(ks[1], (d_kv, d_q)),
                                        _xavier(ks[2], (d_kv, d_q))],
                                       axis=1).astype(bf16),
                'bkv': jnp.zeros(2 * d_q, jnp.float32),
                # output projection stored head-major: (H, hd, d_q)
                'wo': _xavier(ks[3], (d_q, d_q), gain)
                      .reshape(num_heads, hd_c, d_q).astype(bf16),
                'bo': jnp.zeros(d_q, jnp.float32),
            },
            # conv taps stacked as (3, D, D): applied to x[l-1], x[l], x[l+1]
            'conv_w': jax.random.uniform(ks[4], (3, d_q, d_q), jnp.float32,
                                         -conv_bound, conv_bound).astype(bf16),
            'conv_b': jax.random.uniform(ks[5], (d_q,), jnp.float32,
                                         -conv_bound, conv_bound),
            'ln_ffn': (jnp.ones(d_q, jnp.float32), jnp.zeros(d_q, jnp.float32)),
            'ffn_w1': _kaiming(ks[6], (d_q, 4 * d_q)).astype(bf16),
            'ffn_b1': jnp.zeros(4 * d_q, jnp.float32),
            'ffn_w2': _xavier(ks[7], (4 * d_q, d_q), gain).astype(bf16),
            'ffn_b2': jnp.zeros(d_q, jnp.float32),
            'ln_self': (jnp.ones(d_q, jnp.float32), jnp.zeros(d_q, jnp.float32)),
            'self': {
                # fused Q|K|V projection, scale folded into the Q third
                'wqkv': jnp.concatenate([_xavier(ks[8], (d_q, dps)) * sc_s,
                                         _xavier(ks[9], (d_q, dps)),
                                         _xavier(ks[10], (d_q, dps))],
                                        axis=1).astype(bf16),
                'bqkv': jnp.zeros(3 * dps, jnp.float32),
                'wo': _xavier(ks[11], (dps, d_q), gain)
                      .reshape(num_heads, hd_s, d_q).astype(bf16),
                'bo': jnp.zeros(d_q, jnp.float32),
            },
        }
        blocks.append(blk)
    return {'blocks': blocks,
            'ln_final': (jnp.ones(d_q, jnp.float32), jnp.zeros(d_q, jnp.float32))}


# --------------------------------------------------------------------- main --

if __name__ == "__main__":
    num_blocks = 2
    num_heads = 4
    B, L, D = 2, 8, 32          # target: batch x target_len x d_model
    S, d_kv = 8, 16             # encoder: batch x source_len x d_kv
    Nr = 2                      # number of groups; L must be divisible by Nr

    key = jax.random.PRNGKey(0)
    k_in, k_enc, k_pos, k_par = jax.random.split(key, 4)
    inp = jax.random.normal(k_in, (B, L, D), jnp.float32)
    enc = jax.random.normal(k_enc, (B, S, d_kv), jnp.float32)
    pos_emb = jax.random.normal(k_pos, (1, L, D), jnp.float32)  # unused, as in reference

    params = init_params(k_par, num_blocks, D, d_kv, num_heads)

    fwd = jax.jit(transformer_decoder_forward, static_argnums=(4, 5))
    out = fwd(params, inp, enc, pos_emb, Nr, num_heads)
    out = jax.block_until_ready(out)

    assert out.shape == (B, L, D) and out.dtype == jnp.float32
    assert bool(jnp.all(jnp.isfinite(out)))
    print("KERNEL_OK")
</pallas_src>

<mosaic_0001>
module attributes {stable_mosaic.version = 11 : i64} {
  func.func @_linear_kernel(%arg0: i32, %arg1: memref<16x16xf32, #tpu.memory_space<vmem>>, %arg2: memref<16x64xbf16, #tpu.memory_space<vmem>>, %arg3: memref<1x64xf32, #tpu.memory_space<vmem>>, %arg4: memref<16x64xf32, #tpu.memory_space<vmem>>) attributes {dimension_semantics = [#tpu.dimension_semantics<parallel>], iteration_bounds = array<i64: 1>, scalar_prefetch = 0 : i64, scratch_operands = 0 : i64, tpu.core_type = #tpu.core_type<tc>, window_params = [{transform_indices = @transform_0, window_bounds = array<i64: 16, 16>}, {pipeline_mode = #tpu.pipeline_mode<synchronous>, transform_indices = @transform_1, window_bounds = array<i64: 16, 64>}, {pipeline_mode = #tpu.pipeline_mode<synchronous>, transform_indices = @transform_2, window_bounds = array<i64: 1, 64>}, {transform_indices = @transform_3, window_bounds = array<i64: 16, 64>}]} {
    %c0 = arith.constant 0 : index
    %c0_0 = arith.constant 0 : index
    %0 = vector.load %arg1[%c0, %c0_0] : memref<16x16xf32, #tpu.memory_space<vmem>>, vector<16x16xf32>
    %1 = arith.truncf %0 : vector<16x16xf32> to vector<16x16xbf16>
    %c0_1 = arith.constant 0 : index
    %c0_2 = arith.constant 0 : index
    %2 = vector.load %arg2[%c0_1, %c0_2] : memref<16x64xbf16, #tpu.memory_space<vmem>>, vector<16x64xbf16>
    %cst = arith.constant dense<0.000000e+00> : vector<16x64xf32>
    %3 = tpu.matmul %1, %2, %cst {dimension_numbers = #tpu.dot_dimension_numbers<[1], [0], [0], [1], [0, 0, 1, 1], [], []>} : vector<16x16xbf16>, vector<16x64xbf16>, vector<16x64xf32> -> vector<16x64xf32>
    %c0_3 = arith.constant 0 : index
    %c0_4 = arith.constant 0 : index
    %4 = vector.load %arg3[%c0_3, %c0_4] : memref<1x64xf32, #tpu.memory_space<vmem>>, vector<1x64xf32>
    %5 = vector.broadcast %4 : vector<1x64xf32> to vector<16x64xf32>
    %6 = arith.addf %3, %5 : vector<16x64xf32>
    %c0_5 = arith.constant 0 : index
    %c0_6 = arith.constant 0 : index
    %7 = vector.load %arg4[%c0_5, %c0_6] : memref<16x64xf32, #tpu.memory_space<vmem>>, vector<16x64xf32>
    tpu.vector_store %arg4[%c0_5, %c0_6], %6 {strides = array<i32>} : memref<16x64xf32, #tpu.memory_space<vmem>>, vector<16x64xf32>,
    return
  }
  func.func @transform_0(%arg0: i32) -> (i32, i32) {
    %c0_i32 = arith.constant 0 : i32
    %c0_i32_0 = arith.constant 0 : i32
    return %arg0, %c0_i32 : i32, i32
  }
  func.func @transform_1(%arg0: i32) -> (i32, i32) {
    %c0_i32 = arith.constant 0 : i32
    %c0_i32_0 = arith.constant 0 : i32
    %c0_i32_1 = arith.constant 0 : i32
    return %c0_i32, %c0_i32_0 : i32, i32
  }
  func.func @transform_2(%arg0: i32) -> (i32, i32) {
    %c0_i32 = arith.constant 0 : i32
    %c0_i32_0 = arith.constant 0 : i32
    %c0_i32_1 = arith.constant 0 : i32
    return %c0_i32, %c0_i32_0 : i32, i32
  }
  func.func @transform_3(%arg0: i32) -> (i32, i32) {
    %c0_i32 = arith.constant 0 : i32
    %c0_i32_0 = arith.constant 0 : i32
    return %arg0, %c0_i32 : i32, i32
  }
}

module attributes {stable_mosaic.version = 11 : i64} {
  func.func @_ln_matmul_kernel(%arg0: i32, %arg1: memref<16x32xf32, #tpu.memory_space<vmem>>, %arg2: memref<1x32xf32, #tpu.memory_space<vmem>>, %arg3: memref<1x32xf32, #tpu.memory_space<vmem>>, %arg4: memref<32x32xbf16, #tpu.memory_space<vmem>>, %arg5: memref<1x32xf32, #tpu.memory_space<vmem>>, %arg6: memref<16x32xf32, #tpu.memory_space<vmem>>) attributes {dimension_semantics = [#tpu.dimension_semantics<parallel>], iteration_bounds = array<i64: 1>, scalar_prefetch = 0 : i64, scratch_operands = 0 : i64, tpu.core_type = #tpu.core_type<tc>, window_params = [{transform_indices = @transform_0, window_bounds = array<i64: 16, 32>}, {pipeline_mode = #tpu.pipeline_mode<synchronous>, transform_indices = @transform_1, window_bounds = array<i64: 1, 32>}, {pipeline_mode = #tpu.pipeline_mode<synchronous>, transform_indices = @transform_2, window_bounds = array<i64: 1, 32>}, {pipeline_mode = #tpu.pipeline_mode<synchronous>, transform_indices = @transform_3, window_bounds = array<i64: 32, 32>}, {pipeline_mode = #tpu.pipeline_mode<synchronous>, transform_indices = @transform_4, window_bounds = array<i64: 1, 32>}, {transform_indices = @transform_5, window_bounds = array<i64: 16, 32>}]} {
    %c0 = arith.constant 0 : index
    %c0_0 = arith.constant 0 : index
    %0 = vector.load %arg1[%c0, %c0_0] : memref<16x32xf32, #tpu.memory_space<vmem>>, vector<16x32xf32>
    %cst = arith.constant dense<0.000000e+00> : vector<16xf32>
    %1 = vector.multi_reduction <add>, %0, %cst [1] : vector<16x32xf32> to vector<16xf32>
    %2 = vector.shape_cast %1 : vector<16xf32> to vector<16x1xf32>
    %cst_1 = arith.constant 3.200000e+01 : f32
    %3 = vector.broadcast %cst_1 : f32 to vector<16x1xf32>
    %4 = arith.divf %2, %3 : vector<16x1xf32>
    %5 = vector.broadcast %4 : vector<16x1xf32> to vector<16x32xf32>
    %6 = arith.subf %0, %5 : vector<16x32xf32>
    %7 = arith.mulf %6, %6 : vector<16x32xf32>
    %cst_2 = arith.constant dense<0.000000e+00> : vector<16xf32>
    %8 = vector.multi_reduction <add>, %7, %cst_2 [1] : vector<16x32xf32> to vector<16xf32>
    %9 = vector.shape_cast %8 : vector<16xf32> to vector<16x1xf32>
    %cst_3 = arith.constant 3.200000e+01 : f32
    %10 = vector.broadcast %cst_3 : f32 to vector<16x1xf32>
    %11 = arith.divf %9, %10 : vector<16x1xf32>
    %cst_4 = arith.constant 9.99999974E-6 : f32
    %12 = vector.broadcast %cst_4 : f32 to vector<16x1xf32>
    %13 = arith.addf %11, %12 : vector<16x1xf32>
    %14 = math.rsqrt %13 : vector<16x1xf32>
    %15 = vector.broadcast %14 : vector<16x1xf32> to vector<16x32xf32>
    %16 = arith.mulf %6, %15 : vector<16x32xf32>
    %c0_5 = arith.constant 0 : index
    %c0_6 = arith.constant 0 : index
    %17 = vector.load %arg2[%c0_5, %c0_6] : memref<1x32xf32, #tpu.memory_space<vmem>>, vector<1x32xf32>
    %18 = vector.broadcast %17 : vector<1x32xf32> to vector<16x32xf32>
    %19 = arith.mulf %16, %18 : vector<16x32xf32>
    %c0_7 = arith.constant 0 : index
    %c0_8 = arith.constant 0 : index
    %20 = vector.load %arg3[%c0_7, %c0_8] : memref<1x32xf32, #tpu.memory_space<vmem>>, vector<1x32xf32>
    %21 = vector.broadcast %20 : vector<1x32xf32> to vector<16x32xf32>
    %22 = arith.addf %19, %21 : vector<16x32xf32>
    %23 = arith.truncf %22 : vector<16x32xf32> to vector<16x32xbf16>
    %c0_9 = arith.constant 0 : index
    %c0_10 = arith.constant 0 : index
    %24 = vector.load %arg4[%c0_9, %c0_10] : memref<32x32xbf16, #tpu.memory_space<vmem>>, vector<32x32xbf16>
    %cst_11 = arith.constant dense<0.000000e+00> : vector<16x32xf32>
    %25 = tpu.matmul %23, %24, %cst_11 {dimension_numbers = #tpu.dot_dimension_numbers<[1], [0], [0], [1], [0, 0, 1, 1], [], []>} : vector<16x32xbf16>, vector<32x32xbf16>, vector<16x32xf32> -> vector<16x32xf32>
    %c0_12 = arith.constant 0 : index
    %c0_13 = arith.constant 0 : index
    %26 = vector.load %arg5[%c0_12, %c0_13] : memref<1x32xf32, #tpu.memory_space<vmem>>, vector<1x32xf32>
    %27 = vector.broadcast %26 : vector<1x32xf32> to vector<16x32xf32>
    %28 = arith.addf %25, %27 : vector<16x32xf32>
    %c0_14 = arith.constant 0 : index
    %c0_15 = arith.constant 0 : index
    %29 = vector.load %arg6[%c0_14, %c0_15] : memref<16x32xf32, #tpu.memory_space<vmem>>, vector<16x32xf32>
    tpu.vector_store %arg6[%c0_14, %c0_15], %28 {strides = array<i32>} : memref<16x32xf32, #tpu.memory_space<vmem>>, vector<16x32xf32>,
    return
  }
  func.func @transform_0(%arg0: i32) -> (i32, i32) {
    %c0_i32 = arith.constant 0 : i32
    %c0_i32_0 = arith.constant 0 : i32
    return %arg0, %c0_i32 : i32, i32
  }
  func.func @transform_1(%arg0: i32) -> (i32, i32) {
    %c0_i32 = arith.constant 0 : i32
    %c0_i32_0 = arith.constant 0 : i32
    %c0_i32_1 = arith.constant 0 : i32
    return %c0_i32, %c0_i32_0 : i32, i32
  }
  func.func @transform_2(%arg0: i32) -> (i32, i32) {
    %c0_i32 = arith.constant 0 : i32
    %c0_i32_0 = arith.constant 0 : i32
    %c0_i32_1 = arith.constant 0 : i32
    return %c0_i32, %c0_i32_0 : i32, i32
  }
  func.func @transform_3(%arg0: i32) -> (i32, i32) {
    %c0_i32 = arith.constant 0 : i32
    %c0_i32_0 = arith.constant 0 : i32
    %c0_i32_1 = arith.constant 0 : i32
    return %c0_i32, %c0_i32_0 : i32, i32
  }
  func.func @transform_4(%arg0: i32) -> (i32, i32) {
    %c0_i32 = arith.constant 0 : i32
    %c0_i32_0 = arith.constant 0 : i32
    %c0_i32_1 = arith.constant 0 : i32
    return %c0_i32, %c0_i32_0 : i32, i32
  }
  func.func @transform_5(%arg0: i32) -> (i32, i32) {
    %c0_i32 = arith.constant 0 : i32
    %c0_i32_0 = arith.constant 0 : i32
    return %arg0, %c0_i32 : i32, i32
  }
}

module attributes {stable_mosaic.version = 11 : i64} {
  func.func @_cross_attn_proj_kernel(%arg0: i32, %arg1: memref<1x8x32xf32, #tpu.memory_space<vmem>>, %arg2: memref<1x8x64xf32, #tpu.memory_space<vmem>>, %arg3: memref<4x8x32xbf16, #tpu.memory_space<vmem>>, %arg4: memref<1x32xf32, #tpu.memory_space<vmem>>, %arg5: memref<1x8x32xf32, #tpu.memory_space<vmem>>) attributes {dimension_semantics = [#tpu.dimension_semantics<parallel>], iteration_bounds = array<i64: 2>, scalar_prefetch = 0 : i64, scratch_operands = 0 : i64, tpu.core_type = #tpu.core_type<tc>, window_params = [{transform_indices = @transform_0, window_bounds = array<i64: 1, 8, 32>}, {transform_indices = @transform_1, window_bounds = array<i64: 1, 8, 64>}, {pipeline_mode = #tpu.pipeline_mode<synchronous>, transform_indices = @transform_2, window_bounds = array<i64: 4, 8, 32>}, {pipeline_mode = #tpu.pipeline_mode<synchronous>, transform_indices = @transform_3, window_bounds = array<i64: 1, 32>}, {transform_indices = @transform_4, window_bounds = array<i64: 1, 8, 32>}]} {
    %c0 = arith.constant 0 : index
    %c0_0 = arith.constant 0 : index
    %c0_1 = arith.constant 0 : index
    %0 = vector.load %arg1[%c0, %c0_0, %c0_1] : memref<1x8x32xf32, #tpu.memory_space<vmem>>, vector<1x8x32xf32>
    %1 = vector.shape_cast %0 : vector<1x8x32xf32> to vector<8x32xf32>
    %c0_2 = arith.constant 0 : index
    %c0_3 = arith.constant 0 : index
    %c0_4 = arith.constant 0 : index
    %2 = vector.load %arg2[%c0_2, %c0_3, %c0_4] : memref<1x8x64xf32, #tpu.memory_space<vmem>>, vector<1x8x64xf32>
    %3 = vector.shape_cast %2 : vector<1x8x64xf32> to vector<8x64xf32>
    %4 = vector.extract_strided_slice %3 {offsets = [0, 0], sizes = [8, 32], strides = [1, 1]} : vector<8x64xf32> to vector<8x32xf32>
    %5 = vector.extract_strided_slice %3 {offsets = [0, 32], sizes = [8, 32], strides = [1, 1]} : vector<8x64xf32> to vector<8x32xf32>
    %c0_5 = arith.constant 0 : index
    %c0_6 = arith.constant 0 : index
    %6 = vector.load %arg4[%c0_5, %c0_6] : memref<1x32xf32, #tpu.memory_space<vmem>>, vector<1x32xf32>
    %cst = arith.constant 0.000000e+00 : f32
    %7 = vector.broadcast %cst : f32 to vector<8x32xf32>
    %8 = vector.extract_strided_slice %1 {offsets = [0, 0], sizes = [8, 8], strides = [1, 1]} : vector<8x32xf32> to vector<8x8xf32>
    %9 = arith.truncf %8 : vector<8x8xf32> to vector<8x8xbf16>
    %10 = vector.extract_strided_slice %4 {offsets = [0, 0], sizes = [8, 8], strides = [1, 1]} : vector<8x32xf32> to vector<8x8xf32>
    %11 = arith.truncf %10 : vector<8x8xf32> to vector<8x8xbf16>
    %12 = vector.extract_strided_slice %5 {offsets = [0, 0], sizes = [8, 8], strides = [1, 1]} : vector<8x32xf32> to vector<8x8xf32>
    %13 = arith.truncf %12 : vector<8x8xf32> to vector<8x8xbf16>
    %cst_7 = arith.constant dense<0.000000e+00> : vector<8x8xf32>
    %14 = tpu.matmul %9, %11, %cst_7 {dimension_numbers = #tpu.dot_dimension_numbers<[1], [1], [0], [0], [0, 0, 1, 0], [], []>} : vector<8x8xbf16>, vector<8x8xbf16>, vector<8x8xf32> -> vector<8x8xf32>
    %cst_8 = arith.constant dense<0xFF800000> : vector<8xf32>
    %15 = vector.multi_reduction <maximumf>, %14, %cst_8 [1] : vector<8x8xf32> to vector<8xf32>
    %16 = vector.shape_cast %15 : vector<8xf32> to vector<8x1xf32>
    %17 = vector.broadcast %16 : vector<8x1xf32> to vector<8x8xf32>
    %18 = arith.subf %14, %17 : vector<8x8xf32>
    %19 = math.exp %18 : vector<8x8xf32>
    %cst_9 = arith.constant dense<0.000000e+00> : vector<8xf32>
    %20 = vector.multi_reduction <add>, %19, %cst_9 [1] : vector<8x8xf32> to vector<8xf32>
    %21 = vector.shape_cast %20 : vector<8xf32> to vector<8x1xf32>
    %22 = tpu.reciprocal %21 {approx = true} : vector<8x1xf32> -> vector<8x1xf32>
    %23 = vector.broadcast %22 : vector<8x1xf32> to vector<8x8xf32>
    %24 = arith.mulf %19, %23 : vector<8x8xf32>
    %25 = arith.truncf %24 : vector<8x8xf32> to vector<8x8xbf16>
    %cst_10 = arith.constant dense<0.000000e+00> : vector<8x8xf32>
    %26 = tpu.matmul %25, %13, %cst_10 {dimension_numbers = #tpu.dot_dimension_numbers<[1], [0], [0], [1], [0, 0, 1, 1], [], []>} : vector<8x8xbf16>, vector<8x8xbf16>, vector<8x8xf32> -> vector<8x8xf32>
    %27 = arith.truncf %26 : vector<8x8xf32> to vector<8x8xbf16>
    %c0_11 = arith.constant 0 : index
    %c0_12 = arith.constant 0 : index
    %c0_13 = arith.constant 0 : index
    %28 = vector.load %arg3[%c0_11, %c0_12, %c0_13] : memref<4x8x32xbf16, #tpu.memory_space<vmem>>, vector<1x8x32xbf16>
    %29 = vector.shape_cast %28 : vector<1x8x32xbf16> to vector<8x32xbf16>
    %cst_14 = arith.constant dense<0.000000e+00> : vector<8x32xf32>
    %30 = tpu.matmul %27, %29, %cst_14 {dimension_numbers = #tpu.dot_dimension_numbers<[1], [0], [0], [1], [0, 0, 1, 1], [], []>} : vector<8x8xbf16>, vector<8x32xbf16>, vector<8x32xf32> -> vector<8x32xf32>
    %31 = arith.addf %7, %30 : vector<8x32xf32>
    %32 = vector.extract_strided_slice %1 {offsets = [0, 8], sizes = [8, 8], strides = [1, 1]} : vector<8x32xf32> to vector<8x8xf32>
    %33 = arith.truncf %32 : vector<8x8xf32> to vector<8x8xbf16>
    %34 = vector.extract_strided_slice %4 {offsets = [0, 8], sizes = [8, 8], strides = [1, 1]} : vector<8x32xf32> to vector<8x8xf32>
    %35 = arith.truncf %34 : vector<8x8xf32> to vector<8x8xbf16>
    %36 = vector.extract_strided_slice %5 {offsets = [0, 8], sizes = [8, 8], strides = [1, 1]} : vector<8x32xf32> to vector<8x8xf32>
    %37 = arith.truncf %36 : vector<8x8xf32> to vector<8x8xbf16>
    %cst_15 = arith.constant dense<0.000000e+00> : vector<8x8xf32>
    %38 = tpu.matmul %33, %35, %cst_15 {dimension_numbers = #tpu.dot_dimension_numbers<[1], [1], [0], [0], [0, 0, 1, 0], [], []>} : vector<8x8xbf16>, vector<8x8xbf16>, vector<8x8xf32> -> vector<8x8xf32>
    %cst_16 = arith.constant dense<0xFF800000> : vector<8xf32>
    %39 = vector.multi_reduction <maximumf>, %38, %cst_16 [1] : vector<8x8xf32> to vector<8xf32>
    %40 = vector.shape_cast %39 : vector<8xf32> to vector<8x1xf32>
    %41 = vector.broadcast %40 : vector<8x1xf32> to vector<8x8xf32>
    %42 = arith.subf %38, %41 : vector<8x8xf32>
    %43 = math.exp %42 : vector<8x8xf32>
    %cst_17 = arith.constant dense<0.000000e+00> : vector<8xf32>
    %44 = vector.multi_reduction <add>, %43, %cst_17 [1] : vector<8x8xf32> to vector<8xf32>
    %45 = vector.shape_cast %44 : vector<8xf32> to vector<8x1xf32>
    %46 = tpu.reciprocal %45 {approx = true} : vector<8x1xf32> -> vector<8x1xf32>
    %47 = vector.broadcast %46 : vector<8x1xf32> to vector<8x8xf32>
    %48 = arith.mulf %43, %47 : vector<8x8xf32>
    %49 = arith.truncf %48 : vector<8x8xf32> to vector<8x8xbf16>
    %cst_18 = arith.constant dense<0.000000e+00> : vector<8x8xf32>
    %50 = tpu.matmul %49, %37, %cst_18 {dimension_numbers = #tpu.dot_dimension_numbers<[1], [0], [0], [1], [0, 0, 1, 1], [], []>} : vector<8x8xbf16>, vector<8x8xbf16>, vector<8x8xf32> -> vector<8x8xf32>
    %51 = arith.truncf %50 : vector<8x8xf32> to vector<8x8xbf16>
    %c1 = arith.constant 1 : index
    %c0_19 = arith.constant 0 : index
    %c0_20 = arith.constant 0 : index
    %52 = vector.load %arg3[%c1, %c0_19, %c0_20] : memref<4x8x32xbf16, #tpu.memory_space<vmem>>, vector<1x8x32xbf16>
    %53 = vector.shape_cast %52 : vector<1x8x32xbf16> to vector<8x32xbf16>
    %cst_21 = arith.constant dense<0.000000e+00> : vector<8x32xf32>
    %54 = tpu.matmul %51, %53, %cst_21 {dimension_numbers = #tpu.dot_dimension_numbers<[1], [0], [0], [1], [0, 0, 1, 1], [], []>} : vector<8x8xbf16>, vector<8x32xbf16>, vector<8x32xf32> -> vector<8x32xf32>
    %55 = arith.addf %31, %54 : vector<8x32xf32>
    %56 = vector.extract_strided_slice %1 {offsets = [0, 16], sizes = [8, 8], strides = [1, 1]} : vector<8x32xf32> to vector<8x8xf32>
    %57 = arith.truncf %56 : vector<8x8xf32> to vector<8x8xbf16>
    %58 = vector.extract_strided_slice %4 {offsets = [0, 16], sizes = [8, 8], strides = [1, 1]} : vector<8x32xf32> to vector<8x8xf32>
    %59 = arith.truncf %58 : vector<8x8xf32> to vector<8x8xbf16>
    %60 = vector.extract_strided_slice %5 {offsets = [0, 16], sizes = [8, 8], strides = [1, 1]} : vector<8x32xf32> to vector<8x8xf32>
    %61 = arith.truncf %60 : vector<8x8xf32> to vector<8x8xbf16>
    %cst_22 = arith.constant dense<0.000000e+00> : vector<8x8xf32>
    %62 = tpu.matmul %57, %59, %cst_22 {dimension_numbers = #tpu.dot_dimension_numbers<[1], [1], [0], [0], [0, 0, 1, 0], [], []>} : vector<8x8xbf16>, vector<8x8xbf16>, vector<8x8xf32> -> vector<8x8xf32>
    %cst_23 = arith.constant dense<0xFF800000> : vector<8xf32>
    %63 = vector.multi_reduction <maximumf>, %62, %cst_23 [1] : vector<8x8xf32> to vector<8xf32>
    %64 = vector.shape_cast %63 : vector<8xf32> to vector<8x1xf32>
    %65 = vector.broadcast %64 : vector<8x1xf32> to vector<8x8xf32>
    %66 = arith.subf %62, %65 : vector<8x8xf32>
    %67 = math.exp %66 : vector<8x8xf32>
    %cst_24 = arith.constant dense<0.000000e+00> : vector<8xf32>
    %68 = vector.multi_reduction <add>, %67, %cst_24 [1] : vector<8x8xf32> to vector<8xf32>
    %69 = vector.shape_cast %68 : vector<8xf32> to vector<8x1xf32>
    %70 = tpu.reciprocal %69 {approx = true} : vector<8x1xf32> -> vector<8x1xf32>
    %71 = vector.broadcast %70 : vector<8x1xf32> to vector<8x8xf32>
    %72 = arith.mulf %67, %71 : vector<8x8xf32>
    %73 = arith.truncf %72 : vector<8x8xf32> to vector<8x8xbf16>
    %cst_25 = arith.constant dense<0.000000e+00> : vector<8x8xf32>
    %74 = tpu.matmul %73, %61, %cst_25 {dimension_numbers = #tpu.dot_dimension_numbers<[1], [0], [0], [1], [0, 0, 1, 1], [], []>} : vector<8x8xbf16>, vector<8x8xbf16>, vector<8x8xf32> -> vector<8x8xf32>
    %75 = arith.truncf %74 : vector<8x8xf32> to vector<8x8xbf16>
    %c2 = arith.constant 2 : index
    %c0_26 = arith.constant 0 : index
    %c0_27 = arith.constant 0 : index
    %76 = vector.load %arg3[%c2, %c0_26, %c0_27] : memref<4x8x32xbf16, #tpu.memory_space<vmem>>, vector<1x8x32xbf16>
    %77 = vector.shape_cast %76 : vector<1x8x32xbf16> to vector<8x32xbf16>
    %cst_28 = arith.constant dense<0.000000e+00> : vector<8x32xf32>
    %78 = tpu.matmul %75, %77, %cst_28 {dimension_numbers = #tpu.dot_dimension_numbers<[1], [0], [0], [1], [0, 0, 1, 1], [], []>} : vector<8x8xbf16>, vector<8x32xbf16>, vector<8x32xf32> -> vector<8x32xf32>
    %79 = arith.addf %55, %78 : vector<8x32xf32>
    %80 = vector.extract_strided_slice %1 {offsets = [0, 24], sizes = [8, 8], strides = [1, 1]} : vector<8x32xf32> to vector<8x8xf32>
    %81 = arith.truncf %80 : vector<8x8xf32> to vector<8x8xbf16>
    %82 = vector.extract_strided_slice %4 {offsets = [0, 24], sizes = [8, 8], strides = [1, 1]} : vector<8x32xf32> to vector<8x8xf32>
    %83 = arith.truncf %82 : vector<8x8xf32> to vector<8x8xbf16>
    %84 = vector.extract_strided_slice %5 {offsets = [0, 24], sizes = [8, 8], strides = [1, 1]} : vector<8x32xf32> to vector<8x8xf32>
    %85 = arith.truncf %84 : vector<8x8xf32> to vector<8x8xbf16>
    %cst_29 = arith.constant dense<0.000000e+00> : vector<8x8xf32>
    %86 = tpu.matmul %81, %83, %cst_29 {dimension_numbers = #tpu.dot_dimension_numbers<[1], [1], [0], [0], [0, 0, 1, 0], [], []>} : vector<8x8xbf16>, vector<8x8xbf16>, vector<8x8xf32> -> vector<8x8xf32>
    %cst_30 = arith.constant dense<0xFF800000> : vector<8xf32>
    %87 = vector.multi_reduction <maximumf>, %86, %cst_30 [1] : vector<8x8xf32> to vector<8xf32>
    %88 = vector.shape_cast %87 : vector<8xf32> to vector<8x1xf32>
    %89 = vector.broadcast %88 : vector<8x1xf32> to vector<8x8xf32>
    %90 = arith.subf %86, %89 : vector<8x8xf32>
    %91 = math.exp %90 : vector<8x8xf32>
    %cst_31 = arith.constant dense<0.000000e+00> : vector<8xf32>
    %92 = vector.multi_reduction <add>, %91, %cst_31 [1] : vector<8x8xf32> to vector<8xf32>
    %93 = vector.shape_cast %92 : vector<8xf32> to vector<8x1xf32>
    %94 = tpu.reciprocal %93 {approx = true} : vector<8x1xf32> -> vector<8x1xf32>
    %95 = vector.broadcast %94 : vector<8x1xf32> to vector<8x8xf32>
    %96 = arith.mulf %91, %95 : vector<8x8xf32>
    %97 = arith.truncf %96 : vector<8x8xf32> to vector<8x8xbf16>
    %cst_32 = arith.constant dense<0.000000e+00> : vector<8x8xf32>
    %98 = tpu.matmul %97, %85, %cst_32 {dimension_numbers = #tpu.dot_dimension_numbers<[1], [0], [0], [1], [0, 0, 1, 1], [], []>} : vector<8x8xbf16>, vector<8x8xbf16>, vector<8x8xf32> -> vector<8x8xf32>
    %99 = arith.truncf %98 : vector<8x8xf32> to vector<8x8xbf16>
    %c3 = arith.constant 3 : index
    %c0_33 = arith.constant 0 : index
    %c0_34 = arith.constant 0 : index
    %100 = vector.load %arg3[%c3, %c0_33, %c0_34] : memref<4x8x32xbf16, #tpu.memory_space<vmem>>, vector<1x8x32xbf16>
    %101 = vector.shape_cast %100 : vector<1x8x32xbf16> to vector<8x32xbf16>
    %cst_35 = arith.constant dense<0.000000e+00> : vector<8x32xf32>
    %102 = tpu.matmul %99, %101, %cst_35 {dimension_numbers = #tpu.dot_dimension_numbers<[1], [0], [0], [1], [0, 0, 1, 1], [], []>} : vector<8x8xbf16>, vector<8x32xbf16>, vector<8x32xf32> -> vector<8x32xf32>
    %103 = arith.addf %79, %102 : vector<8x32xf32>
    %104 = vector.broadcast %6 : vector<1x32xf32> to vector<8x32xf32>
    %105 = arith.addf %103, %104 : vector<8x32xf32>
    %c0_36 = arith.constant 0 : index
    %c0_37 = arith.constant 0 : index
    %c0_38 = arith.constant 0 : index
    %106 = vector.load %arg5[%c0_36, %c0_37, %c0_38] : memref<1x8x32xf32, #tpu.memory_space<vmem>>, vector<1x8x32xf32>
    %107 = vector.shape_cast %106 : vector<1x8x32xf32> to vector<8x32xf32>
    %108 = vector.shape_cast %105 : vector<8x32xf32> to vector<1x8x32xf32>
    tpu.vector_store %arg5[%c0_36, %c0_37, %c0_38], %108 {strides = array<i32>} : memref<1x8x32xf32, #tpu.memory_space<vmem>>, vector<1x8x32xf32>,
    return
  }
  func.func @transform_0(%arg0: i32) -> (i32, i32, i32) {
    %c0_i32 = arith.constant 0 : i32
    %c0_i32_0 = arith.constant 0 : i32
    %c0_i32_1 = arith.constant 0 : i32
    return %arg0, %c0_i32, %c0_i32_0 : i32, i32, i32
  }
  func.func @transform_1(%arg0: i32) -> (i32, i32, i32) {
    %c0_i32 = arith.constant 0 : i32
    %c0_i32_0 = arith.constant 0 : i32
    %c0_i32_1 = arith.constant 0 : i32
    return %arg0, %c0_i32, %c0_i32_0 : i32, i32, i32
  }
  func.func @transform_2(%arg0: i32) -> (i32, i32, i32) {
    %c0_i32 = arith.constant 0 : i32
    %c0_i32_0 = arith.constant 0 : i32
    %c0_i32_1 = arith.constant 0 : i32
    %c0_i32_2 = arith.constant 0 : i32
    return %c0_i32, %c0_i32_0, %c0_i32_1 : i32, i32, i32
  }
  func.func @transform_3(%arg0: i32) -> (i32, i32) {
    %c0_i32 = arith.constant 0 : i32
    %c0_i32_0 = arith.constant 0 : i32
    %c0_i32_1 = arith.constant 0 : i32
    return %c0_i32, %c0_i32_0 : i32, i32
  }
  func.func @transform_4(%arg0: i32) -> (i32, i32, i32) {
    %c0_i32 = arith.constant 0 : i32
    %c0_i32_0 = arith.constant 0 : i32
    %c0_i32_1 = arith.constant 0 : i32
    return %arg0, %c0_i32, %c0_i32_0 : i32, i32, i32
  }
}

module attributes {stable_mosaic.version = 11 : i64} {
  func.func @_conv_ffn_kernel(%arg0: i32, %arg1: memref<1x4x32xf32, #tpu.memory_space<vmem>>, %arg2: memref<1x4x32xf32, #tpu.memory_space<vmem>>, %arg3: memref<3x32x32xbf16, #tpu.memory_space<vmem>>, %arg4: memref<1x32xf32, #tpu.memory_space<vmem>>, %arg5: memref<1x32xf32, #tpu.memory_space<vmem>>, %arg6: memref<1x32xf32, #tpu.memory_space<vmem>>, %arg7: memref<32x128xbf16, #tpu.memory_space<vmem>>, %arg8: memref<1x128xf32, #tpu.memory_space<vmem>>, %arg9: memref<128x32xbf16, #tpu.memory_space<vmem>>, %arg10: memref<1x32xf32, #tpu.memory_space<vmem>>, %arg11: memref<1x4x32xf32, #tpu.memory_space<vmem>>) attributes {dimension_semantics = [#tpu.dimension_semantics<parallel>], iteration_bounds = array<i64: 4>, scalar_prefetch = 0 : i64, scratch_operands = 0 : i64, tpu.core_type = #tpu.core_type<tc>, window_params = [{transform_indices = @transform_0, window_bounds = array<i64: 1, 4, 32>}, {transform_indices = @transform_1, window_bounds = array<i64: 1, 4, 32>}, {pipeline_mode = #tpu.pipeline_mode<synchronous>, transform_indices = @transform_2, window_bounds = array<i64: 3, 32, 32>}, {pipeline_mode = #tpu.pipeline_mode<synchronous>, transform_indices = @transform_3, window_bounds = array<i64: 1, 32>}, {pipeline_mode = #tpu.pipeline_mode<synchronous>, transform_indices = @transform_4, window_bounds = array<i64: 1, 32>}, {pipeline_mode = #tpu.pipeline_mode<synchronous>, transform_indices = @transform_5, window_bounds = array<i64: 1, 32>}, {pipeline_mode = #tpu.pipeline_mode<synchronous>, transform_indices = @transform_6, window_bounds = array<i64: 32, 128>}, {pipeline_mode = #tpu.pipeline_mode<synchronous>, transform_indices = @transform_7, window_bounds = array<i64: 1, 128>}, {pipeline_mode = #tpu.pipeline_mode<synchronous>, transform_indices = @transform_8, window_bounds = array<i64: 128, 32>}, {pipeline_mode = #tpu.pipeline_mode<synchronous>, transform_indices = @transform_9, window_bounds = array<i64: 1, 32>}, {transform_indices = @transform_10, window_bounds = array<i64: 1, 4, 32>}]} {
    %c0 = arith.constant 0 : index
    %c0_0 = arith.constant 0 : index
    %c0_1 = arith.constant 0 : index
    %0 = vector.load %arg1[%c0, %c0_0, %c0_1] : memref<1x4x32xf32, #tpu.memory_space<vmem>>, vector<1x4x32xf32>
    %1 = vector.shape_cast %0 : vector<1x4x32xf32> to vector<4x32xf32>
    %cst = arith.constant 0.000000e+00 : f32
    %2 = vector.broadcast %cst : f32 to vector<1x32xf32>
    %3 = vector.extract_strided_slice %1 {offsets = [0, 0], sizes = [3, 32], strides = [1, 1]} : vector<4x32xf32> to vector<3x32xf32>
    %4 = tpu.concatenate %2, %3 in 0 : vector<1x32xf32>, vector<3x32xf32> -> vector<4x32xf32>
    %5 = arith.truncf %4 : vector<4x32xf32> to vector<4x32xbf16>
    %6 = vector.extract_strided_slice %1 {offsets = [1, 0], sizes = [3, 32], strides = [1, 1]} : vector<4x32xf32> to vector<3x32xf32>
    %7 = tpu.concatenate %6, %2 in 0 : vector<3x32xf32>, vector<1x32xf32> -> vector<4x32xf32>
    %8 = arith.truncf %7 : vector<4x32xf32> to vector<4x32xbf16>
    %9 = arith.truncf %1 : vector<4x32xf32> to vector<4x32xbf16>
    %c1 = arith.constant 1 : index
    %c0_2 = arith.constant 0 : index
    %c0_3 = arith.constant 0 : index
    %10 = vector.load %arg3[%c1, %c0_2, %c0_3] : memref<3x32x32xbf16, #tpu.memory_space<vmem>>, vector<1x32x32xbf16>
    %11 = vector.shape_cast %10 : vector<1x32x32xbf16> to vector<32x32xbf16>
    %cst_4 = arith.constant dense<0.000000e+00> : vector<4x32xf32>
    %12 = tpu.matmul %9, %11, %cst_4 {dimension_numbers = #tpu.dot_dimension_numbers<[1], [0], [0], [1], [0, 0, 1, 1], [], []>} : vector<4x32xbf16>, vector<32x32xbf16>, vector<4x32xf32> -> vector<4x32xf32>
    %c0_5 = arith.constant 0 : index
    %c0_6 = arith.constant 0 : index
    %c0_7 = arith.constant 0 : index
    %13 = vector.load %arg3[%c0_5, %c0_6, %c0_7] : memref<3x32x32xbf16, #tpu.memory_space<vmem>>, vector<1x32x32xbf16>
    %14 = vector.shape_cast %13 : vector<1x32x32xbf16> to vector<32x32xbf16>
    %cst_8 = arith.constant dense<0.000000e+00> : vector<4x32xf32>
    %15 = tpu.matmul %5, %14, %cst_8 {dimension_numbers = #tpu.dot_dimension_numbers<[1], [0], [0], [1], [0, 0, 1, 1], [], []>} : vector<4x32xbf16>, vector<32x32xbf16>, vector<4x32xf32> -> vector<4x32xf32>
    %16 = arith.addf %12, %15 : vector<4x32xf32>
    %c2 = arith.constant 2 : index
    %c0_9 = arith.constant 0 : index
    %c0_10 = arith.constant 0 : index
    %17 = vector.load %arg3[%c2, %c0_9, %c0_10] : memref<3x32x32xbf16, #tpu.memory_space<vmem>>, vector<1x32x32xbf16>
    %18 = vector.shape_cast %17 : vector<1x32x32xbf16> to vector<32x32xbf16>
    %cst_11 = arith.constant dense<0.000000e+00> : vector<4x32xf32>
    %19 = tpu.matmul %8, %18, %cst_11 {dimension_numbers = #tpu.dot_dimension_numbers<[1], [0], [0], [1], [0, 0, 1, 1], [], []>} : vector<4x32xbf16>, vector<32x32xbf16>, vector<4x32xf32> -> vector<4x32xf32>
    %20 = arith.addf %16, %19 : vector<4x32xf32>
    %c0_12 = arith.constant 0 : index
    %c0_13 = arith.constant 0 : index
    %21 = vector.load %arg4[%c0_12, %c0_13] : memref<1x32xf32, #tpu.memory_space<vmem>>, vector<1x32xf32>
    %22 = vector.broadcast %21 : vector<1x32xf32> to vector<4x32xf32>
    %23 = arith.addf %20, %22 : vector<4x32xf32>
    %cst_14 = arith.constant 0.000000e+00 : f32
    %24 = vector.broadcast %cst_14 : f32 to vector<4x32xf32>
    %25 = arith.maximumf %23, %24 : vector<4x32xf32>
    %c0_15 = arith.constant 0 : index
    %c0_16 = arith.constant 0 : index
    %c0_17 = arith.constant 0 : index
    %26 = vector.load %arg2[%c0_15, %c0_16, %c0_17] : memref<1x4x32xf32, #tpu.memory_space<vmem>>, vector<1x4x32xf32>
    %27 = vector.shape_cast %26 : vector<1x4x32xf32> to vector<4x32xf32>
    %28 = arith.addf %27, %25 : vector<4x32xf32>
    %cst_18 = arith.constant dense<0.000000e+00> : vector<4xf32>
    %29 = vector.multi_reduction <add>, %25, %cst_18 [1] : vector<4x32xf32> to vector<4xf32>
    %30 = vector.shape_cast %29 : vector<4xf32> to vector<4x1xf32>
    %cst_19 = arith.constant 3.200000e+01 : f32
    %31 = vector.broadcast %cst_19 : f32 to vector<4x1xf32>
    %32 = arith.divf %30, %31 : vector<4x1xf32>
    %33 = vector.broadcast %32 : vector<4x1xf32> to vector<4x32xf32>
    %34 = arith.subf %25, %33 : vector<4x32xf32>
    %35 = arith.mulf %34, %34 : vector<4x32xf32>
    %cst_20 = arith.constant dense<0.000000e+00> : vector<4xf32>
    %36 = vector.multi_reduction <add>, %35, %cst_20 [1] : vector<4x32xf32> to vector<4xf32>
    %37 = vector.shape_cast %36 : vector<4xf32> to vector<4x1xf32>
    %cst_21 = arith.constant 3.200000e+01 : f32
    %38 = vector.broadcast %cst_21 : f32 to vector<4x1xf32>
    %39 = arith.divf %37, %38 : vector<4x1xf32>
    %cst_22 = arith.constant 9.99999974E-6 : f32
    %40 = vector.broadcast %cst_22 : f32 to vector<4x1xf32>
    %41 = arith.addf %39, %40 : vector<4x1xf32>
    %42 = math.rsqrt %41 : vector<4x1xf32>
    %43 = vector.broadcast %42 : vector<4x1xf32> to vector<4x32xf32>
    %44 = arith.mulf %34, %43 : vector<4x32xf32>
    %c0_23 = arith.constant 0 : index
    %c0_24 = arith.constant 0 : index
    %45 = vector.load %arg5[%c0_23, %c0_24] : memref<1x32xf32, #tpu.memory_space<vmem>>, vector<1x32xf32>
    %46 = vector.broadcast %45 : vector<1x32xf32> to vector<4x32xf32>
    %47 = arith.mulf %44, %46 : vector<4x32xf32>
    %c0_25 = arith.constant 0 : index
    %c0_26 = arith.constant 0 : index
    %48 = vector.load %arg6[%c0_25, %c0_26] : memref<1x32xf32, #tpu.memory_space<vmem>>, vector<1x32xf32>
    %49 = vector.broadcast %48 : vector<1x32xf32> to vector<4x32xf32>
    %50 = arith.addf %47, %49 : vector<4x32xf32>
    %51 = arith.truncf %50 : vector<4x32xf32> to vector<4x32xbf16>
    %c0_27 = arith.constant 0 : index
    %c0_28 = arith.constant 0 : index
    %52 = vector.load %arg7[%c0_27, %c0_28] : memref<32x128xbf16, #tpu.memory_space<vmem>>, vector<32x128xbf16>
    %cst_29 = arith.constant dense<0.000000e+00> : vector<4x128xf32>
    %53 = tpu.matmul %51, %52, %cst_29 {dimension_numbers = #tpu.dot_dimension_numbers<[1], [0], [0], [1], [0, 0, 1, 1], [], []>} : vector<4x32xbf16>, vector<32x128xbf16>, vector<4x128xf32> -> vector<4x128xf32>
    %c0_30 = arith.constant 0 : index
    %c0_31 = arith.constant 0 : index
    %54 = vector.load %arg8[%c0_30, %c0_31] : memref<1x128xf32, #tpu.memory_space<vmem>>, vector<1x128xf32>
    %55 = vector.broadcast %54 : vector<1x128xf32> to vector<4x128xf32>
    %56 = arith.addf %53, %55 : vector<4x128xf32>
    %cst_32 = arith.constant 0.000000e+00 : f32
    %57 = vector.broadcast %cst_32 : f32 to vector<4x128xf32>
    %58 = arith.maximumf %56, %57 : vector<4x128xf32>
    %59 = arith.truncf %58 : vector<4x128xf32> to vector<4x128xbf16>
    %c0_33 = arith.constant 0 : index
    %c0_34 = arith.constant 0 : index
    %60 = vector.load %arg9[%c0_33, %c0_34] : memref<128x32xbf16, #tpu.memory_space<vmem>>, vector<128x32xbf16>
    %cst_35 = arith.constant dense<0.000000e+00> : vector<4x32xf32>
    %61 = tpu.matmul %59, %60, %cst_35 {dimension_numbers = #tpu.dot_dimension_numbers<[1], [0], [0], [1], [0, 0, 1, 1], [], []>} : vector<4x128xbf16>, vector<128x32xbf16>, vector<4x32xf32> -> vector<4x32xf32>
    %62 = arith.addf %28, %61 : vector<4x32xf32>
    %c0_36 = arith.constant 0 : index
    %c0_37 = arith.constant 0 : index
    %63 = vector.load %arg10[%c0_36, %c0_37] : memref<1x32xf32, #tpu.memory_space<vmem>>, vector<1x32xf32>
    %64 = vector.broadcast %63 : vector<1x32xf32> to vector<4x32xf32>
    %65 = arith.addf %62, %64 : vector<4x32xf32>
    %c0_38 = arith.constant 0 : index
    %c0_39 = arith.constant 0 : index
    %c0_40 = arith.constant 0 : index
    %66 = vector.load %arg11[%c0_38, %c0_39, %c0_40] : memref<1x4x32xf32, #tpu.memory_space<vmem>>, vector<1x4x32xf32>
    %67 = vector.shape_cast %66 : vector<1x4x32xf32> to vector<4x32xf32>
    %68 = vector.shape_cast %65 : vector<4x32xf32> to vector<1x4x32xf32>
    tpu.vector_store %arg11[%c0_38, %c0_39, %c0_40], %68 {strides = array<i32>} : memref<1x4x32xf32, #tpu.memory_space<vmem>>, vector<1x4x32xf32>,
    return
  }
  func.func @transform_0(%arg0: i32) -> (i32, i32, i32) {
    %c0_i32 = arith.constant 0 : i32
    %c0_i32_0 = arith.constant 0 : i32
    %c0_i32_1 = arith.constant 0 : i32
    return %arg0, %c0_i32, %c0_i32_0 : i32, i32, i32
  }
  func.func @transform_1(%arg0: i32) -> (i32, i32, i32) {
    %c0_i32 = arith.constant 0 : i32
    %c0_i32_0 = arith.constant 0 : i32
    %c0_i32_1 = arith.constant 0 : i32
    return %arg0, %c0_i32, %c0_i32_0 : i32, i32, i32
  }
  func.func @transform_2(%arg0: i32) -> (i32, i32, i32) {
    %c0_i32 = arith.constant 0 : i32
    %c0_i32_0 = arith.constant 0 : i32
    %c0_i32_1 = arith.constant 0 : i32
    %c0_i32_2 = arith.constant 0 : i32
    return %c0_i32, %c0_i32_0, %c0_i32_1 : i32, i32, i32
  }
  func.func @transform_3(%arg0: i32) -> (i32, i32) {
    %c0_i32 = arith.constant 0 : i32
    %c0_i32_0 = arith.constant 0 : i32
    %c0_i32_1 = arith.constant 0 : i32
    return %c0_i32, %c0_i32_0 : i32, i32
  }
  func.func @transform_4(%arg0: i32) -> (i32, i32) {
    %c0_i32 = arith.constant 0 : i32
    %c0_i32_0 = arith.constant 0 : i32
    %c0_i32_1 = arith.constant 0 : i32
    return %c0_i32, %c0_i32_0 : i32, i32
  }
  func.func @transform_5(%arg0: i32) -> (i32, i32) {
    %c0_i32 = arith.constant 0 : i32
    %c0_i32_0 = arith.constant 0 : i32
    %c0_i32_1 = arith.constant 0 : i32
    return %c0_i32, %c0_i32_0 : i32, i32
  }
  func.func @transform_6(%arg0: i32) -> (i32, i32) {
    %c0_i32 = arith.constant 0 : i32
    %c0_i32_0 = arith.constant 0 : i32
    %c0_i32_1 = arith.constant 0 : i32
    return %c0_i32, %c0_i32_0 : i32, i32
  }
  func.func @transform_7(%arg0: i32) -> (i32, i32) {
    %c0_i32 = arith.constant 0 : i32
    %c0_i32_0 = arith.constant 0 : i32
    %c0_i32_1 = arith.constant 0 : i32
    return %c0_i32, %c0_i32_0 : i32, i32
  }
  func.func @transform_8(%arg0: i32) -> (i32, i32) {
    %c0_i32 = arith.constant 0 : i32
    %c0_i32_0 = arith.constant 0 : i32
    %c0_i32_1 = arith.constant 0 : i32
    return %c0_i32, %c0_i32_0 : i32, i32
  }
  func.func @transform_9(%arg0: i32) -> (i32, i32) {
    %c0_i32 = arith.constant 0 : i32
    %c0_i32_0 = arith.constant 0 : i32
    %c0_i32_1 = arith.constant 0 : i32
    return %c0_i32, %c0_i32_0 : i32, i32
  }
  func.func @transform_10(%arg0: i32) -> (i32, i32, i32) {
    %c0_i32 = arith.constant 0 : i32
    %c0_i32_0 = arith.constant 0 : i32
    %c0_i32_1 = arith.constant 0 : i32
    return %arg0, %c0_i32, %c0_i32_0 : i32, i32, i32
  }
}

module attributes {stable_mosaic.version = 11 : i64} {
  func.func @_ln_matmul_kernel(%arg0: i32, %arg1: memref<16x32xf32, #tpu.memory_space<vmem>>, %arg2: memref<1x32xf32, #tpu.memory_space<vmem>>, %arg3: memref<1x32xf32, #tpu.memory_space<vmem>>, %arg4: memref<32x24xbf16, #tpu.memory_space<vmem>>, %arg5: memref<1x24xf32, #tpu.memory_space<vmem>>, %arg6: memref<16x24xf32, #tpu.memory_space<vmem>>) attributes {dimension_semantics = [#tpu.dimension_semantics<parallel>], iteration_bounds = array<i64: 1>, scalar_prefetch = 0 : i64, scratch_operands = 0 : i64, tpu.core_type = #tpu.core_type<tc>, window_params = [{transform_indices = @transform_0, window_bounds = array<i64: 16, 32>}, {pipeline_mode = #tpu.pipeline_mode<synchronous>, transform_indices = @transform_1, window_bounds = array<i64: 1, 32>}, {pipeline_mode = #tpu.pipeline_mode<synchronous>, transform_indices = @transform_2, window_bounds = array<i64: 1, 32>}, {pipeline_mode = #tpu.pipeline_mode<synchronous>, transform_indices = @transform_3, window_bounds = array<i64: 32, 24>}, {pipeline_mode = #tpu.pipeline_mode<synchronous>, transform_indices = @transform_4, window_bounds = array<i64: 1, 24>}, {transform_indices = @transform_5, window_bounds = array<i64: 16, 24>}]} {
    %c0 = arith.constant 0 : index
    %c0_0 = arith.constant 0 : index
    %0 = vector.load %arg1[%c0, %c0_0] : memref<16x32xf32, #tpu.memory_space<vmem>>, vector<16x32xf32>
    %cst = arith.constant dense<0.000000e+00> : vector<16xf32>
    %1 = vector.multi_reduction <add>, %0, %cst [1] : vector<16x32xf32> to vector<16xf32>
    %2 = vector.shape_cast %1 : vector<16xf32> to vector<16x1xf32>
    %cst_1 = arith.constant 3.200000e+01 : f32
    %3 = vector.broadcast %cst_1 : f32 to vector<16x1xf32>
    %4 = arith.divf %2, %3 : vector<16x1xf32>
    %5 = vector.broadcast %4 : vector<16x1xf32> to vector<16x32xf32>
    %6 = arith.subf %0, %5 : vector<16x32xf32>
    %7 = arith.mulf %6, %6 : vector<16x32xf32>
    %cst_2 = arith.constant dense<0.000000e+00> : vector<16xf32>
    %8 = vector.multi_reduction <add>, %7, %cst_2 [1] : vector<16x32xf32> to vector<16xf32>
    %9 = vector.shape_cast %8 : vector<16xf32> to vector<16x1xf32>
    %cst_3 = arith.constant 3.200000e+01 : f32
    %10 = vector.broadcast %cst_3 : f32 to vector<16x1xf32>
    %11 = arith.divf %9, %10 : vector<16x1xf32>
    %cst_4 = arith.constant 9.99999974E-6 : f32
    %12 = vector.broadcast %cst_4 : f32 to vector<16x1xf32>
    %13 = arith.addf %11, %12 : vector<16x1xf32>
    %14 = math.rsqrt %13 : vector<16x1xf32>
    %15 = vector.broadcast %14 : vector<16x1xf32> to vector<16x32xf32>
    %16 = arith.mulf %6, %15 : vector<16x32xf32>
    %c0_5 = arith.constant 0 : index
    %c0_6 = arith.constant 0 : index
    %17 = vector.load %arg2[%c0_5, %c0_6] : memref<1x32xf32, #tpu.memory_space<vmem>>, vector<1x32xf32>
    %18 = vector.broadcast %17 : vector<1x32xf32> to vector<16x32xf32>
    %19 = arith.mulf %16, %18 : vector<16x32xf32>
    %c0_7 = arith.constant 0 : index
    %c0_8 = arith.constant 0 : index
    %20 = vector.load %arg3[%c0_7, %c0_8] : memref<1x32xf32, #tpu.memory_space<vmem>>, vector<1x32xf32>
    %21 = vector.broadcast %20 : vector<1x32xf32> to vector<16x32xf32>
    %22 = arith.addf %19, %21 : vector<16x32xf32>
    %23 = arith.truncf %22 : vector<16x32xf32> to vector<16x32xbf16>
    %c0_9 = arith.constant 0 : index
    %c0_10 = arith.constant 0 : index
    %24 = vector.load %arg4[%c0_9, %c0_10] : memref<32x24xbf16, #tpu.memory_space<vmem>>, vector<32x24xbf16>
    %cst_11 = arith.constant dense<0.000000e+00> : vector<16x24xf32>
    %25 = tpu.matmul %23, %24, %cst_11 {dimension_numbers = #tpu.dot_dimension_numbers<[1], [0], [0], [1], [0, 0, 1, 1], [], []>} : vector<16x32xbf16>, vector<32x24xbf16>, vector<16x24xf32> -> vector<16x24xf32>
    %c0_12 = arith.constant 0 : index
    %c0_13 = arith.constant 0 : index
    %26 = vector.load %arg5[%c0_12, %c0_13] : memref<1x24xf32, #tpu.memory_space<vmem>>, vector<1x24xf32>
    %27 = vector.broadcast %26 : vector<1x24xf32> to vector<16x24xf32>
    %28 = arith.addf %25, %27 : vector<16x24xf32>
    %c0_14 = arith.constant 0 : index
    %c0_15 = arith.constant 0 : index
    %29 = vector.load %arg6[%c0_14, %c0_15] : memref<16x24xf32, #tpu.memory_space<vmem>>, vector<16x24xf32>
    tpu.vector_store %arg6[%c0_14, %c0_15], %28 {strides = array<i32>} : memref<16x24xf32, #tpu.memory_space<vmem>>, vector<16x24xf32>,
    return
  }
  func.func @transform_0(%arg0: i32) -> (i32, i32) {
    %c0_i32 = arith.constant 0 : i32
    %c0_i32_0 = arith.constant 0 : i32
    return %arg0, %c0_i32 : i32, i32
  }
  func.func @transform_1(%arg0: i32) -> (i32, i32) {
    %c0_i32 = arith.constant 0 : i32
    %c0_i32_0 = arith.constant 0 : i32
    %c0_i32_1 = arith.constant 0 : i32
    return %c0_i32, %c0_i32_0 : i32, i32
  }
  func.func @transform_2(%arg0: i32) -> (i32, i32) {
    %c0_i32 = arith.constant 0 : i32
    %c0_i32_0 = arith.constant 0 : i32
    %c0_i32_1 = arith.constant 0 : i32
    return %c0_i32, %c0_i32_0 : i32, i32
  }
  func.func @transform_3(%arg0: i32) -> (i32, i32) {
    %c0_i32 = arith.constant 0 : i32
    %c0_i32_0 = arith.constant 0 : i32
    %c0_i32_1 = arith.constant 0 : i32
    return %c0_i32, %c0_i32_0 : i32, i32
  }
  func.func @transform_4(%arg0: i32) -> (i32, i32) {
    %c0_i32 = arith.constant 0 : i32
    %c0_i32_0 = arith.constant 0 : i32
    %c0_i32_1 = arith.constant 0 : i32
    return %c0_i32, %c0_i32_0 : i32, i32
  }
  func.func @transform_5(%arg0: i32) -> (i32, i32) {
    %c0_i32 = arith.constant 0 : i32
    %c0_i32_0 = arith.constant 0 : i32
    return %arg0, %c0_i32 : i32, i32
  }
}

module attributes {stable_mosaic.version = 11 : i64} {
  func.func @_self_attn_proj_res_kernel(%arg0: i32, %arg1: memref<1x4x24xf32, #tpu.memory_space<vmem>>, %arg2: memref<1x4x32xf32, #tpu.memory_space<vmem>>, %arg3: memref<4x2x32xbf16, #tpu.memory_space<vmem>>, %arg4: memref<1x32xf32, #tpu.memory_space<vmem>>, %arg5: memref<1x4x32xf32, #tpu.memory_space<vmem>>) attributes {dimension_semantics = [#tpu.dimension_semantics<parallel>], iteration_bounds = array<i64: 4>, scalar_prefetch = 0 : i64, scratch_operands = 0 : i64, tpu.core_type = #tpu.core_type<tc>, window_params = [{transform_indices = @transform_0, window_bounds = array<i64: 1, 4, 24>}, {transform_indices = @transform_1, window_bounds = array<i64: 1, 4, 32>}, {pipeline_mode = #tpu.pipeline_mode<synchronous>, transform_indices = @transform_2, window_bounds = array<i64: 4, 2, 32>}, {pipeline_mode = #tpu.pipeline_mode<synchronous>, transform_indices = @transform_3, window_bounds = array<i64: 1, 32>}, {transform_indices = @transform_4, window_bounds = array<i64: 1, 4, 32>}]} {
    %c0 = arith.constant 0 : index
    %c0_0 = arith.constant 0 : index
    %c0_1 = arith.constant 0 : index
    %0 = vector.load %arg1[%c0, %c0_0, %c0_1] : memref<1x4x24xf32, #tpu.memory_space<vmem>>, vector<1x4x24xf32>
    %1 = vector.shape_cast %0 : vector<1x4x24xf32> to vector<4x24xf32>
    %2 = vector.extract_strided_slice %1 {offsets = [0, 0], sizes = [4, 8], strides = [1, 1]} : vector<4x24xf32> to vector<4x8xf32>
    %3 = vector.extract_strided_slice %1 {offsets = [0, 8], sizes = [4, 8], strides = [1, 1]} : vector<4x24xf32> to vector<4x8xf32>
    %4 = vector.extract_strided_slice %1 {offsets = [0, 16], sizes = [4, 8], strides = [1, 1]} : vector<4x24xf32> to vector<4x8xf32>
    %c0_2 = arith.constant 0 : index
    %c0_3 = arith.constant 0 : index
    %5 = vector.load %arg4[%c0_2, %c0_3] : memref<1x32xf32, #tpu.memory_space<vmem>>, vector<1x32xf32>
    %cst = arith.constant 0.000000e+00 : f32
    %6 = vector.broadcast %cst : f32 to vector<4x32xf32>
    %7 = vector.extract_strided_slice %2 {offsets = [0, 0], sizes = [4, 2], strides = [1, 1]} : vector<4x8xf32> to vector<4x2xf32>
    %8 = arith.truncf %7 : vector<4x2xf32> to vector<4x2xbf16>
    %9 = vector.extract_strided_slice %3 {offsets = [0, 0], sizes = [4, 2], strides = [1, 1]} : vector<4x8xf32> to vector<4x2xf32>
    %10 = arith.truncf %9 : vector<4x2xf32> to vector<4x2xbf16>
    %11 = vector.extract_strided_slice %4 {offsets = [0, 0], sizes = [4, 2], strides = [1, 1]} : vector<4x8xf32> to vector<4x2xf32>
    %12 = arith.truncf %11 : vector<4x2xf32> to vector<4x2xbf16>
    %cst_4 = arith.constant dense<0.000000e+00> : vector<4x4xf32>
    %13 = tpu.matmul %8, %10, %cst_4 {dimension_numbers = #tpu.dot_dimension_numbers<[1], [1], [0], [0], [0, 0, 1, 0], [], []>} : vector<4x2xbf16>, vector<4x2xbf16>, vector<4x4xf32> -> vector<4x4xf32>
    %cst_5 = arith.constant dense<0xFF800000> : vector<4xf32>
    %14 = vector.multi_reduction <maximumf>, %13, %cst_5 [1] : vector<4x4xf32> to vector<4xf32>
    %15 = vector.shape_cast %14 : vector<4xf32> to vector<4x1xf32>
    %16 = vector.broadcast %15 : vector<4x1xf32> to vector<4x4xf32>
    %17 = arith.subf %13, %16 : vector<4x4xf32>
    %18 = math.exp %17 : vector<4x4xf32>
    %cst_6 = arith.constant dense<0.000000e+00> : vector<4xf32>
    %19 = vector.multi_reduction <add>, %18, %cst_6 [1] : vector<4x4xf32> to vector<4xf32>
    %20 = vector.shape_cast %19 : vector<4xf32> to vector<4x1xf32>
    %21 = tpu.reciprocal %20 {approx = true} : vector<4x1xf32> -> vector<4x1xf32>
    %22 = vector.broadcast %21 : vector<4x1xf32> to vector<4x4xf32>
    %23 = arith.mulf %18, %22 : vector<4x4xf32>
    %24 = arith.truncf %23 : vector<4x4xf32> to vector<4x4xbf16>
    %cst_7 = arith.constant dense<0.000000e+00> : vector<4x2xf32>
    %25 = tpu.matmul %24, %12, %cst_7 {dimension_numbers = #tpu.dot_dimension_numbers<[1], [0], [0], [1], [0, 0, 1, 1], [], []>} : vector<4x4xbf16>, vector<4x2xbf16>, vector<4x2xf32> -> vector<4x2xf32>
    %26 = arith.truncf %25 : vector<4x2xf32> to vector<4x2xbf16>
    %c0_8 = arith.constant 0 : index
    %c0_9 = arith.constant 0 : index
    %c0_10 = arith.constant 0 : index
    %27 = vector.load %arg3[%c0_8, %c0_9, %c0_10] : memref<4x2x32xbf16, #tpu.memory_space<vmem>>, vector<1x2x32xbf16>
    %28 = vector.shape_cast %27 : vector<1x2x32xbf16> to vector<2x32xbf16>
    %cst_11 = arith.constant dense<0.000000e+00> : vector<4x32xf32>
    %29 = tpu.matmul %26, %28, %cst_11 {dimension_numbers = #tpu.dot_dimension_numbers<[1], [0], [0], [1], [0, 0, 1, 1], [], []>} : vector<4x2xbf16>, vector<2x32xbf16>, vector<4x32xf32> -> vector<4x32xf32>
    %30 = arith.addf %6, %29 : vector<4x32xf32>
    %31 = vector.extract_strided_slice %2 {offsets = [0, 2], sizes = [4, 2], strides = [1, 1]} : vector<4x8xf32> to vector<4x2xf32>
    %32 = arith.truncf %31 : vector<4x2xf32> to vector<4x2xbf16>
    %33 = vector.extract_strided_slice %3 {offsets = [0, 2], sizes = [4, 2], strides = [1, 1]} : vector<4x8xf32> to vector<4x2xf32>
    %34 = arith.truncf %33 : vector<4x2xf32> to vector<4x2xbf16>
    %35 = vector.extract_strided_slice %4 {offsets = [0, 2], sizes = [4, 2], strides = [1, 1]} : vector<4x8xf32> to vector<4x2xf32>
    %36 = arith.truncf %35 : vector<4x2xf32> to vector<4x2xbf16>
    %cst_12 = arith.constant dense<0.000000e+00> : vector<4x4xf32>
    %37 = tpu.matmul %32, %34, %cst_12 {dimension_numbers = #tpu.dot_dimension_numbers<[1], [1], [0], [0], [0, 0, 1, 0], [], []>} : vector<4x2xbf16>, vector<4x2xbf16>, vector<4x4xf32> -> vector<4x4xf32>
    %cst_13 = arith.constant dense<0xFF800000> : vector<4xf32>
    %38 = vector.multi_reduction <maximumf>, %37, %cst_13 [1] : vector<4x4xf32> to vector<4xf32>
    %39 = vector.shape_cast %38 : vector<4xf32> to vector<4x1xf32>
    %40 = vector.broadcast %39 : vector<4x1xf32> to vector<4x4xf32>
    %41 = arith.subf %37, %40 : vector<4x4xf32>
    %42 = math.exp %41 : vector<4x4xf32>
    %cst_14 = arith.constant dense<0.000000e+00> : vector<4xf32>
    %43 = vector.multi_reduction <add>, %42, %cst_14 [1] : vector<4x4xf32> to vector<4xf32>
    %44 = vector.shape_cast %43 : vector<4xf32> to vector<4x1xf32>
    %45 = tpu.reciprocal %44 {approx = true} : vector<4x1xf32> -> vector<4x1xf32>
    %46 = vector.broadcast %45 : vector<4x1xf32> to vector<4x4xf32>
    %47 = arith.mulf %42, %46 : vector<4x4xf32>
    %48 = arith.truncf %47 : vector<4x4xf32> to vector<4x4xbf16>
    %cst_15 = arith.constant dense<0.000000e+00> : vector<4x2xf32>
    %49 = tpu.matmul %48, %36, %cst_15 {dimension_numbers = #tpu.dot_dimension_numbers<[1], [0], [0], [1], [0, 0, 1, 1], [], []>} : vector<4x4xbf16>, vector<4x2xbf16>, vector<4x2xf32> -> vector<4x2xf32>
    %50 = arith.truncf %49 : vector<4x2xf32> to vector<4x2xbf16>
    %c1 = arith.constant 1 : index
    %c0_16 = arith.constant 0 : index
    %c0_17 = arith.constant 0 : index
    %51 = vector.load %arg3[%c1, %c0_16, %c0_17] : memref<4x2x32xbf16, #tpu.memory_space<vmem>>, vector<1x2x32xbf16>
    %52 = vector.shape_cast %51 : vector<1x2x32xbf16> to vector<2x32xbf16>
    %cst_18 = arith.constant dense<0.000000e+00> : vector<4x32xf32>
    %53 = tpu.matmul %50, %52, %cst_18 {dimension_numbers = #tpu.dot_dimension_numbers<[1], [0], [0], [1], [0, 0, 1, 1], [], []>} : vector<4x2xbf16>, vector<2x32xbf16>, vector<4x32xf32> -> vector<4x32xf32>
    %54 = arith.addf %30, %53 : vector<4x32xf32>
    %55 = vector.extract_strided_slice %2 {offsets = [0, 4], sizes = [4, 2], strides = [1, 1]} : vector<4x8xf32> to vector<4x2xf32>
    %56 = arith.truncf %55 : vector<4x2xf32> to vector<4x2xbf16>
    %57 = vector.extract_strided_slice %3 {offsets = [0, 4], sizes = [4, 2], strides = [1, 1]} : vector<4x8xf32> to vector<4x2xf32>
    %58 = arith.truncf %57 : vector<4x2xf32> to vector<4x2xbf16>
    %59 = vector.extract_strided_slice %4 {offsets = [0, 4], sizes = [4, 2], strides = [1, 1]} : vector<4x8xf32> to vector<4x2xf32>
    %60 = arith.truncf %59 : vector<4x2xf32> to vector<4x2xbf16>
    %cst_19 = arith.constant dense<0.000000e+00> : vector<4x4xf32>
    %61 = tpu.matmul %56, %58, %cst_19 {dimension_numbers = #tpu.dot_dimension_numbers<[1], [1], [0], [0], [0, 0, 1, 0], [], []>} : vector<4x2xbf16>, vector<4x2xbf16>, vector<4x4xf32> -> vector<4x4xf32>
    %cst_20 = arith.constant dense<0xFF800000> : vector<4xf32>
    %62 = vector.multi_reduction <maximumf>, %61, %cst_20 [1] : vector<4x4xf32> to vector<4xf32>
    %63 = vector.shape_cast %62 : vector<4xf32> to vector<4x1xf32>
    %64 = vector.broadcast %63 : vector<4x1xf32> to vector<4x4xf32>
    %65 = arith.subf %61, %64 : vector<4x4xf32>
    %66 = math.exp %65 : vector<4x4xf32>
    %cst_21 = arith.constant dense<0.000000e+00> : vector<4xf32>
    %67 = vector.multi_reduction <add>, %66, %cst_21 [1] : vector<4x4xf32> to vector<4xf32>
    %68 = vector.shape_cast %67 : vector<4xf32> to vector<4x1xf32>
    %69 = tpu.reciprocal %68 {approx = true} : vector<4x1xf32> -> vector<4x1xf32>
    %70 = vector.broadcast %69 : vector<4x1xf32> to vector<4x4xf32>
    %71 = arith.mulf %66, %70 : vector<4x4xf32>
    %72 = arith.truncf %71 : vector<4x4xf32> to vector<4x4xbf16>
    %cst_22 = arith.constant dense<0.000000e+00> : vector<4x2xf32>
    %73 = tpu.matmul %72, %60, %cst_22 {dimension_numbers = #tpu.dot_dimension_numbers<[1], [0], [0], [1], [0, 0, 1, 1], [], []>} : vector<4x4xbf16>, vector<4x2xbf16>, vector<4x2xf32> -> vector<4x2xf32>
    %74 = arith.truncf %73 : vector<4x2xf32> to vector<4x2xbf16>
    %c2 = arith.constant 2 : index
    %c0_23 = arith.constant 0 : index
    %c0_24 = arith.constant 0 : index
    %75 = vector.load %arg3[%c2, %c0_23, %c0_24] : memref<4x2x32xbf16, #tpu.memory_space<vmem>>, vector<1x2x32xbf16>
    %76 = vector.shape_cast %75 : vector<1x2x32xbf16> to vector<2x32xbf16>
    %cst_25 = arith.constant dense<0.000000e+00> : vector<4x32xf32>
    %77 = tpu.matmul %74, %76, %cst_25 {dimension_numbers = #tpu.dot_dimension_numbers<[1], [0], [0], [1], [0, 0, 1, 1], [], []>} : vector<4x2xbf16>, vector<2x32xbf16>, vector<4x32xf32> -> vector<4x32xf32>
    %78 = arith.addf %54, %77 : vector<4x32xf32>
    %79 = vector.extract_strided_slice %2 {offsets = [0, 6], sizes = [4, 2], strides = [1, 1]} : vector<4x8xf32> to vector<4x2xf32>
    %80 = arith.truncf %79 : vector<4x2xf32> to vector<4x2xbf16>
    %81 = vector.extract_strided_slice %3 {offsets = [0, 6], sizes = [4, 2], strides = [1, 1]} : vector<4x8xf32> to vector<4x2xf32>
    %82 = arith.truncf %81 : vector<4x2xf32> to vector<4x2xbf16>
    %83 = vector.extract_strided_slice %4 {offsets = [0, 6], sizes = [4, 2], strides = [1, 1]} : vector<4x8xf32> to vector<4x2xf32>
    %84 = arith.truncf %83 : vector<4x2xf32> to vector<4x2xbf16>
    %cst_26 = arith.constant dense<0.000000e+00> : vector<4x4xf32>
    %85 = tpu.matmul %80, %82, %cst_26 {dimension_numbers = #tpu.dot_dimension_numbers<[1], [1], [0], [0], [0, 0, 1, 0], [], []>} : vector<4x2xbf16>, vector<4x2xbf16>, vector<4x4xf32> -> vector<4x4xf32>
    %cst_27 = arith.constant dense<0xFF800000> : vector<4xf32>
    %86 = vector.multi_reduction <maximumf>, %85, %cst_27 [1] : vector<4x4xf32> to vector<4xf32>
    %87 = vector.shape_cast %86 : vector<4xf32> to vector<4x1xf32>
    %88 = vector.broadcast %87 : vector<4x1xf32> to vector<4x4xf32>
    %89 = arith.subf %85, %88 : vector<4x4xf32>
    %90 = math.exp %89 : vector<4x4xf32>
    %cst_28 = arith.constant dense<0.000000e+00> : vector<4xf32>
    %91 = vector.multi_reduction <add>, %90, %cst_28 [1] : vector<4x4xf32> to vector<4xf32>
    %92 = vector.shape_cast %91 : vector<4xf32> to vector<4x1xf32>
    %93 = tpu.reciprocal %92 {approx = true} : vector<4x1xf32> -> vector<4x1xf32>
    %94 = vector.broadcast %93 : vector<4x1xf32> to vector<4x4xf32>
    %95 = arith.mulf %90, %94 : vector<4x4xf32>
    %96 = arith.truncf %95 : vector<4x4xf32> to vector<4x4xbf16>
    %cst_29 = arith.constant dense<0.000000e+00> : vector<4x2xf32>
    %97 = tpu.matmul %96, %84, %cst_29 {dimension_numbers = #tpu.dot_dimension_numbers<[1], [0], [0], [1], [0, 0, 1, 1], [], []>} : vector<4x4xbf16>, vector<4x2xbf16>, vector<4x2xf32> -> vector<4x2xf32>
    %98 = arith.truncf %97 : vector<4x2xf32> to vector<4x2xbf16>
    %c3 = arith.constant 3 : index
    %c0_30 = arith.constant 0 : index
    %c0_31 = arith.constant 0 : index
    %99 = vector.load %arg3[%c3, %c0_30, %c0_31] : memref<4x2x32xbf16, #tpu.memory_space<vmem>>, vector<1x2x32xbf16>
    %100 = vector.shape_cast %99 : vector<1x2x32xbf16> to vector<2x32xbf16>
    %cst_32 = arith.constant dense<0.000000e+00> : vector<4x32xf32>
    %101 = tpu.matmul %98, %100, %cst_32 {dimension_numbers = #tpu.dot_dimension_numbers<[1], [0], [0], [1], [0, 0, 1, 1], [], []>} : vector<4x2xbf16>, vector<2x32xbf16>, vector<4x32xf32> -> vector<4x32xf32>
    %102 = arith.addf %78, %101 : vector<4x32xf32>
    %103 = vector.broadcast %5 : vector<1x32xf32> to vector<4x32xf32>
    %104 = arith.addf %102, %103 : vector<4x32xf32>
    %c0_33 = arith.constant 0 : index
    %c0_34 = arith.constant 0 : index
    %c0_35 = arith.constant 0 : index
    %105 = vector.load %arg2[%c0_33, %c0_34, %c0_35] : memref<1x4x32xf32, #tpu.memory_space<vmem>>, vector<1x4x32xf32>
    %106 = vector.shape_cast %105 : vector<1x4x32xf32> to vector<4x32xf32>
    %107 = arith.addf %106, %104 : vector<4x32xf32>
    %c0_36 = arith.constant 0 : index
    %c0_37 = arith.constant 0 : index
    %c0_38 = arith.constant 0 : index
    %108 = vector.load %arg5[%c0_36, %c0_37, %c0_38] : memref<1x4x32xf32, #tpu.memory_space<vmem>>, vector<1x4x32xf32>
    %109 = vector.shape_cast %108 : vector<1x4x32xf32> to vector<4x32xf32>
    %110 = vector.shape_cast %107 : vector<4x32xf32> to vector<1x4x32xf32>
    tpu.vector_store %arg5[%c0_36, %c0_37, %c0_38], %110 {strides = array<i32>} : memref<1x4x32xf32, #tpu.memory_space<vmem>>, vector<1x4x32xf32>,
    return
  }
  func.func @transform_0(%arg0: i32) -> (i32, i32, i32) {
    %c0_i32 = arith.constant 0 : i32
    %c0_i32_0 = arith.constant 0 : i32
    %c0_i32_1 = arith.constant 0 : i32
    return %arg0, %c0_i32, %c0_i32_0 : i32, i32, i32
  }
  func.func @transform_1(%arg0: i32) -> (i32, i32, i32) {
    %c0_i32 = arith.constant 0 : i32
    %c0_i32_0 = arith.constant 0 : i32
    %c0_i32_1 = arith.constant 0 : i32
    return %arg0, %c0_i32, %c0_i32_0 : i32, i32, i32
  }
  func.func @transform_2(%arg0: i32) -> (i32, i32, i32) {
    %c0_i32 = arith.constant 0 : i32
    %c0_i32_0 = arith.constant 0 : i32
    %c0_i32_1 = arith.constant 0 : i32
    %c0_i32_2 = arith.constant 0 : i32
    return %c0_i32, %c0_i32_0, %c0_i32_1 : i32, i32, i32
  }
  func.func @transform_3(%arg0: i32) -> (i32, i32) {
    %c0_i32 = arith.constant 0 : i32
    %c0_i32_0 = arith.constant 0 : i32
    %c0_i32_1 = arith.constant 0 : i32
    return %c0_i32, %c0_i32_0 : i32, i32
  }
  func.func @transform_4(%arg0: i32) -> (i32, i32, i32) {
    %c0_i32 = arith.constant 0 : i32
    %c0_i32_0 = arith.constant 0 : i32
    %c0_i32_1 = arith.constant 0 : i32
    return %arg0, %c0_i32, %c0_i32_0 : i32, i32, i32
  }
}

module attributes {stable_mosaic.version = 11 : i64} {
  func.func @_layernorm_kernel(%arg0: i32, %arg1: memref<16x32xf32, #tpu.memory_space<vmem>>, %arg2: memref<1x32xf32, #tpu.memory_space<vmem>>, %arg3: memref<1x32xf32, #tpu.memory_space<vmem>>, %arg4: memref<16x32xf32, #tpu.memory_space<vmem>>) attributes {dimension_semantics = [#tpu.dimension_semantics<parallel>], iteration_bounds = array<i64: 1>, scalar_prefetch = 0 : i64, scratch_operands = 0 : i64, tpu.core_type = #tpu.core_type<tc>, window_params = [{transform_indices = @transform_0, window_bounds = array<i64: 16, 32>}, {pipeline_mode = #tpu.pipeline_mode<synchronous>, transform_indices = @transform_1, window_bounds = array<i64: 1, 32>}, {pipeline_mode = #tpu.pipeline_mode<synchronous>, transform_indices = @transform_2, window_bounds = array<i64: 1, 32>}, {transform_indices = @transform_3, window_bounds = array<i64: 16, 32>}]} {
    %c0 = arith.constant 0 : index
    %c0_0 = arith.constant 0 : index
    %0 = vector.load %arg1[%c0, %c0_0] : memref<16x32xf32, #tpu.memory_space<vmem>>, vector<16x32xf32>
    %cst = arith.constant dense<0.000000e+00> : vector<16xf32>
    %1 = vector.multi_reduction <add>, %0, %cst [1] : vector<16x32xf32> to vector<16xf32>
    %2 = vector.shape_cast %1 : vector<16xf32> to vector<16x1xf32>
    %cst_1 = arith.constant 3.200000e+01 : f32
    %3 = vector.broadcast %cst_1 : f32 to vector<16x1xf32>
    %4 = arith.divf %2, %3 : vector<16x1xf32>
    %5 = vector.broadcast %4 : vector<16x1xf32> to vector<16x32xf32>
    %6 = arith.subf %0, %5 : vector<16x32xf32>
    %7 = arith.mulf %6, %6 : vector<16x32xf32>
    %cst_2 = arith.constant dense<0.000000e+00> : vector<16xf32>
    %8 = vector.multi_reduction <add>, %7, %cst_2 [1] : vector<16x32xf32> to vector<16xf32>
    %9 = vector.shape_cast %8 : vector<16xf32> to vector<16x1xf32>
    %cst_3 = arith.constant 3.200000e+01 : f32
    %10 = vector.broadcast %cst_3 : f32 to vector<16x1xf32>
    %11 = arith.divf %9, %10 : vector<16x1xf32>
    %cst_4 = arith.constant 9.99999974E-6 : f32
    %12 = vector.broadcast %cst_4 : f32 to vector<16x1xf32>
    %13 = arith.addf %11, %12 : vector<16x1xf32>
    %14 = math.rsqrt %13 : vector<16x1xf32>
    %15 = vector.broadcast %14 : vector<16x1xf32> to vector<16x32xf32>
    %16 = arith.mulf %6, %15 : vector<16x32xf32>
    %c0_5 = arith.constant 0 : index
    %c0_6 = arith.constant 0 : index
    %17 = vector.load %arg2[%c0_5, %c0_6] : memref<1x32xf32, #tpu.memory_space<vmem>>, vector<1x32xf32>
    %18 = vector.broadcast %17 : vector<1x32xf32> to vector<16x32xf32>
    %19 = arith.mulf %16, %18 : vector<16x32xf32>
    %c0_7 = arith.constant 0 : index
    %c0_8 = arith.constant 0 : index
    %20 = vector.load %arg3[%c0_7, %c0_8] : memref<1x32xf32, #tpu.memory_space<vmem>>, vector<1x32xf32>
    %21 = vector.broadcast %20 : vector<1x32xf32> to vector<16x32xf32>
    %22 = arith.addf %19, %21 : vector<16x32xf32>
    %c0_9 = arith.constant 0 : index
    %c0_10 = arith.constant 0 : index
    %23 = vector.load %arg4[%c0_9, %c0_10] : memref<16x32xf32, #tpu.memory_space<vmem>>, vector<16x32xf32>
    tpu.vector_store %arg4[%c0_9, %c0_10], %22 {strides = array<i32>} : memref<16x32xf32, #tpu.memory_space<vmem>>, vector<16x32xf32>,
    return
  }
  func.func @transform_0(%arg0: i32) -> (i32, i32) {
    %c0_i32 = arith.constant 0 : i32
    %c0_i32_0 = arith.constant 0 : i32
    return %arg0, %c0_i32 : i32, i32
  }
  func.func @transform_1(%arg0: i32) -> (i32, i32) {
    %c0_i32 = arith.constant 0 : i32
    %c0_i32_0 = arith.constant 0 : i32
    %c0_i32_1 = arith.constant 0 : i32
    return %c0_i32, %c0_i32_0 : i32, i32
  }
  func.func @transform_2(%arg0: i32) -> (i32, i32) {
    %c0_i32 = arith.constant 0 : i32
    %c0_i32_0 = arith.constant 0 : i32
    %c0_i32_1 = arith.constant 0 : i32
    return %c0_i32, %c0_i32_0 : i32, i32
  }
  func.func @transform_3(%arg0: i32) -> (i32, i32) {
    %c0_i32 = arith.constant 0 : i32
    %c0_i32_0 = arith.constant 0 : i32
    return %arg0, %c0_i32 : i32, i32
  }
}

</mosaic_0001>

<bundles_post_ra>
// kernel: transformer_decoder_forward.13
= control target key start
LH: loop header
LB: loop body
LE: loop exit
PB: predicated region body
PF: predicated region fallthrough
CT: control target
= control target key end

     0   :  { %vm23_vm0 = vcmask 261120   ;;  %v168_v14 = vmov 0.0   ;;  %vm169_vm1 = vmmov 0   ;;  %s234_s0 = inlined_call_operand.vmem [shape: f32[16,32], index: 0, kind: input, shape index: {}]   ;;  %s235_s3 = inlined_call_operand.vmem [shape: bf16[32,32], index: 3, kind: input, shape index: {}]   ;;  %s236_s1 = inlined_call_operand.vmem [shape: f32[1,32], index: 1, kind: input, shape index: {}]   ;;  %s237_s2 = inlined_call_operand.vmem [shape: f32[1,32], index: 2, kind: input, shape index: {}]   ;;  %s238_s4 = inlined_call_operand.vmem [shape: f32[1,32], index: 4, kind: input, shape index: {}]   ;;  %s239_s5 = inlined_call_operand.vmem [shape: f32[16,32], index: 5, kind: output, shape index: {}]  }
   0x1   :  { %v21_v0 = vld [vmem:[%s234_s0] sm:$0xff]  ;;  %v22_v1 = vld [vmem:[%s234_s0 + $0x8] sm:$0xff]  ;;  %152 = vmatprep.subr.bf16.mxu0 %v168_v14  ;;  %156 = vmatprep.mubr.msk.bf16.mxu0 %vm169_vm1, %v168_v14 }
   0x2   :  { %v24_v2 = vsel %vm23_vm0, %v21_v0, 0.0  ;;  %v27_v3 = vsel %vm23_vm0, %v22_v1, 0.0  ;;  %v162_v15 = vld [vmem:[%s235_s3 + $0x8] sm:$0xff]   ;;  %v163_v16 = vld [vmem:[%s235_s3] sm:$0xff]  }
   0x3   :  { %25 = vadd.xlane.f32.xlu0 %v24_v2  ;;  %153 = vmatpush3.bf16.msra.mxu0 %v162_v15  ;;  %v143_v25 = vld [vmem:[%s236_s1] ss:$0 sm:$0xff] }
   0x4   :  { %154 = vmatprep.subr.bf16.mxu0 %v168_v14  ;;  %v144_v29 = vld [vmem:[%s237_s2] ss:$0 sm:$0xff] }
   0x5   :  { %v145_v34 = vld [vmem:[%s238_s4] ss:$0 sm:$0xff] }
   0x7   :  { %28 = vadd.xlane.f32.xlu0 %v27_v3  ;;  %155 = vmatpush3.bf16.msra.mxu0 %v163_v16 }
  0x8c   :  { %v26_v4 = vpop.xlane.xlu0 %25 }
  0x8d   :  { %v31_v5 = vmul.f32 0.03125, %v26_v4 }
  0x8f   :  { %v33_v6 = vsub.f32 %v21_v0, %v31_v5 }
  0x90   :  { %v29_v7 = vpop.xlane.xlu0 %28 }
  0x91   :  { %v32_v8 = vmul.f32 0.03125, %v29_v7  ;;  %v35_v9 = vmul.f32 %v33_v6, %v33_v6 }
  0x93   :  { %v34_v10 = vsub.f32 %v22_v1, %v32_v8  ;;  %v37_v11 = vsel %vm23_vm0, %v35_v9, 0.0 }
  0x94   :  { %38 = vadd.xlane.f32.xlu1 %v37_v11 }
  0x95   :  { %v36_v12 = vmul.f32 %v34_v10, %v34_v10 }
  0x97   :  { %v40_v13 = vsel %vm23_vm0, %v36_v12, 0.0 }
  0x98   :  { %41 = vadd.xlane.f32.xlu1 %v40_v13 }
 0x11d   :  { %v39_v17 = vpop.xlane.xlu1 %38 }
 0x11e   :  { %v43_v18 = vmul.f32 0.03125, %v39_v17 }
 0x120   :  { %v45_v19 = vadd.f32 1e-05, %v43_v18 }
 0x121   :  { %v42_v20 = vpop.xlane.xlu1 %41 }
 0x122   :  { %164 = vrsqrt.f32 %v45_v19  ;;  %v44_v21 = vmul.f32 0.03125, %v42_v20 }
 0x124   :  { %v46_v22 = vadd.f32 1e-05, %v44_v21 }
 0x126   :  { %166 = vrsqrt.f32 %v46_v22 }
 0x12f   :  { %v165_v23 = vpop.eup %164 }
 0x130   :  { %v49_v24 = vmul.f32 %v165_v23, %v33_v6 }
 0x132   :  { %v58_v28 = vmul.f32 %v143_v25, %v49_v24 }
 0x133   :  { %v167_v26 = vpop.eup %166 }
 0x134   :  { %v50_v27 = vmul.f32 %v167_v26, %v34_v10  ;;  %v67_v31 = vadd.f32 %v144_v29, %v58_v28 }
 0x136   :  { %v59_v30 = vmul.f32 %v143_v25, %v50_v27 }
 0x138   :  { %v68_v32 = vadd.f32 %v144_v29, %v59_v30 }
 0x13a   :  { %v69_v33 = vpack.c.bf16 %v68_v32, %v67_v31 }
 0x13c   :  { %157 = vmatmul.mubr.msk.bf16.vlgmr.msra.gmra.mxu0 %vm23_vm0, %v69_v33 }
 0x1fc   :  { %v130_v35 = vpop.f32.mrf.mxu0 }
 0x1fd   :  { %v131_v36 = vadd.f32 %v145_v34, %v130_v35 }
 0x1fe   :  { %v158_v37 = vpop.f32.mrf.mxu0 }
 0x1ff   :  { %137 = vst.msk [vmem:[%s239_s5] sm:$0xff] %vm23_vm0, %v131_v36 }
 0x200   :  { %v133_v38 = vpop.f32.mrf.mxu0 }
 0x201   :  { %v134_v39 = vadd.f32 %v145_v34, %v133_v38 }
 0x202   :  { %v159_v40 = vpop.f32.mrf.mxu0 }
 0x203   :  { %138 = vst.msk [vmem:[%s239_s5 + $0x8] sm:$0xff] %vm23_vm0, %v134_v39 }

// kernel: transformer_decoder_forward.14
= control target key start
LH: loop header
LB: loop body
LE: loop exit
PB: predicated region body
PF: predicated region fallthrough
CT: control target
= control target key end

     0   :  { %v99_v0 = vmov 0.0   ;;  %vm100_vm0 = vmmov 0   ;;  %vm33_vm1 = vcmask 130048   ;;  %vm78_vm2 = vcmask 523264   ;;  %s139_s1 = inlined_call_operand.vmem [shape: bf16[16,64], index: 1, kind: input, shape index: {}]   ;;  %s140_s0 = inlined_call_operand.vmem [shape: f32[16,16], index: 0, kind: input, shape index: {}]   ;;  %s141_s2 = inlined_call_operand.vmem [shape: f32[1,64], index: 2, kind: input, shape index: {}]   ;;  %s142_s3 = inlined_call_operand.vmem [shape: f32[16,64], index: 3, kind: output, shape index: {}]  }
   0x1   :  { %90 = vmatprep.subr.bf16.mxu0 %v99_v0  ;;  %v98_v1 = vld [vmem:[%s139_s1] sm:$0xff]   ;;  %92 = vmatprep.mubr.msk.bf16.mxu0 %vm100_vm0, %v99_v0  ;;  %v16_v3 = vld [vmem:[%s140_s0 + $0x8] sm:$0xff] }
   0x2   :  { %v15_v2 = vld [vmem:[%s140_s0] sm:$0xff]  ;;  %91 = vmatpush3.bf16.msra.mxu0 %v98_v1 }
   0x3   :  { %v17_v4 = vpack.c.bf16 %v16_v3, %v15_v2  ;;  %v85_v5 = vld [vmem:[%s141_s2] ss:$0 sm:$0xff] }
   0x5   :  { %93 = vmatmul.mubr.msk.bf16.vlgmr.msra.gmra.mxu0 %vm33_vm1, %v17_v4 }
  0xc5   :  { %v71_v6 = vpop.f32.mrf.mxu0 }
  0xc6   :  { %v72_v7 = vadd.f32 %v85_v5, %v71_v6 }
  0xc7   :  { %v94_v8 = vpop.f32.mrf.mxu0 }
  0xc8   :  { %79 = vst.msk [vmem:[%s142_s3] sm:$0xff] %vm78_vm2, %v72_v7 }
  0xc9   :  { %v74_v9 = vpop.f32.mrf.mxu0 }
  0xca   :  { %v75_v10 = vadd.f32 %v85_v5, %v74_v9 }
  0xcb   :  { %v95_v11 = vpop.f32.mrf.mxu0 }
  0xcc   :  { %80 = vst.msk [vmem:[%s142_s3 + $0x8] sm:$0xff] %vm78_vm2, %v75_v10 }

// kernel: transformer_decoder_forward.15
= control target key start
LH: loop header
LB: loop body
LE: loop exit
PB: predicated region body
PF: predicated region fallthrough
CT: control target
= control target key end

     0   :  { %s1124_s15 = smov 0   ;;  %s1254_s0 = inlined_call_operand.vmem [shape: f32[2,8,32], index: 0, kind: input, shape index: {}]   ;;  %s1255_s1 = inlined_call_operand.vmem [shape: f32[2,8,64], index: 1, kind: input, shape index: {}]   ;;  %s1256_s2 = inlined_call_operand.vmem [shape: bf16[4,8,32], index: 2, kind: input, shape index: {}]   ;;  %s1257_s3 = inlined_call_operand.vmem [shape: f32[1,32], index: 3, kind: input, shape index: {}]   ;;  %s1258_s4 = inlined_call_operand.vmem [shape: f32[2,8,32], index: 4, kind: output, shape index: {}]  }
   0x1 LB: > { %s927_s16 = sadd.s32 4294967295, %s1088_s15   ;;  %p931_p0 = scmp.ge.s32.totalorder %s1088_s15, 1  ;;  %s1088_s15 = sphi %s1124_s15, %s14_s15  }
   0x2   : > { %p170_p1 = scmp.lt.s32.totalorder %s1088_s15, 3 }
   0x4   : > { %p171_p2 = pnand %p931_p0, %p170_p1 }
   0x5   : > { %p198_p3 = scmp.lt.s32.totalorder (!%p171_p2), %s927_s16, 1  ;;  %s1092_s24 = smov (!%p171_p2), 96  }
   0x6   : > { %174 = sbr.rel (%p171_p2) target bundleno = 2666 (0xa6a), region = 36  ;;  %s1093_s25 = smov (!%p171_p2), 120  }
   0x7   : > { %s1094_s26 = smov (!%p171_p2), 88   ;;  %s1095_s29 = smov (!%p171_p2), 112  }
   0x8   : > { %s1096_s6 = smov (!%p171_p2), 80   ;;  %s1097_s7 = smov (!%p171_p2), 104  }
   0x9   : > { %s1098_s10 = smov (!%p171_p2), 72  }
   0xb   : > { %v1090_v0 = vmov 0.0   ;;  %vm1091_vm0 = vmmov 0   ;;  %s1260_s16 = smov (!%p198_p3, %s927_s16), 1  ;;  %vm216_vm1 = vcmask 64512   ;;  %vm281_vm2 = vcmask 1043456  }
   0xc   : > { %977 = vmatprep.subr.bf16.mxu0 %v1090_v0  ;;  %979 = vmatprep.mubr.msk.bf16.mxu0 %vm1091_vm0, %v1090_v0  ;;  %s1138_s17 = sshll.u32 %s1260_s16, 3  ;;  %v939_v41 = vld [vmem:[%s1256_s2 + $0x4] sm:$0xf]  ;;  %v326_v45 = vld [vmem:[%s1256_s2] sm:$0xf]  ;;  %vm860_vm3 = vcmask 261120  }
   0xd   : > { %983 = vmatprep.subr.bf16.mxu1 %v1090_v0  ;;  %985 = vmatprep.mubr.msk.bf16.mxu1 %vm1091_vm0, %v1090_v0  ;;  %s205_s20 = scalar_lea.vmem %s1255_s1, %s1138_s17  ;;  %s201_s23 = scalar_lea.vmem %s1254_s0, %s1138_s17  ;;  %v445_v42 = vsel %vm281_vm2, %v939_v41, 0  ;;  %v491_v48 = vsel %vm281_vm2, %v326_v45, 0 }
   0xe   : > { %v212_v1 = vld [vmem:[%s205_s20] sm:$0xff]  ;;  %s209_s19 = scalar_lea.vmem %s1258_s4, %s1138_s17 }
   0xf   : > { %v1144_v2 = vpack.c.bf16 %v212_v1, %v212_v1  ;;  %v211_v4 = vld [vmem:[%s201_s23] sm:$0xff] }
  0x10   : > { %v1153_v5 = vpack.c.bf16 %v211_v4, %v211_v4 }
  0x11   : > { %v221_v3 = vsel %vm216_vm1, %v1144_v2, 0  ;;  %276 = vrot.lane.b32.xlu1 %v1144_v2, %s1092_s24 }
  0x12   : > { %978 = vmatpush3.bf16.xpose.msra.mxu0 %v221_v3 }
  0x13   : > { %995 = vmatprep.subr.bf16.mxu0 %v1090_v0 }
  0x15   : > { %330 = vrot.lane.b32.xlu1 %v1144_v2, %s1093_s25 }
  0x19   : > { %980 = vmatmul.mubr.msk.bf16.vlgmr.msra.gmra.mxu0 %vm216_vm1, %v1153_v5 }
  0x1a   : > { %997 = vmatprep.mubr.msk.bf16.mxu0 %vm1091_vm0, %v1090_v0 }
  0x83   : > { %v277_v16 = vpop.permute.xlu1 %276 }
  0x84   : > { %v283_v17 = vsel %vm281_vm2, %v277_v16, 0 }
  0x85   : > { %984 = vmatpush3.bf16.msra.mxu1 %v283_v17 }
  0x86   : > { %989 = vmatprep.subr.bf16.mxu1 %v1090_v0 }
  0x87   : > { %v331_v20 = vpop.permute.xlu1 %330 }
  0x88   : > { %v336_v22 = vsel %vm216_vm1, %v331_v20, 0 }
  0xd9   : > { %v257_v6 = vpop.f32.mrf.mxu0 }
  0xda   : > { %v263_v7 = vsel %vm216_vm1, %v257_v6, -inf }
  0xdb   : > { %264 = vmax.xlane.f32.xlu0 %v263_v7  ;;  %v981_v8 = vpop.f32.mrf.mxu0 }
  0xdd   : > { %v260_v9 = vpop.f32.mrf.mxu0 }
  0xdf   : > { %v982_v10 = vpop.f32.mrf.mxu0 }
 0x164   : > { %v265_v11 = vpop.xlane.xlu0 %264 }
 0x165   : > { %v266_v12 = vsub.f32 %v257_v6, %v265_v11 }
 0x167   : > { %v267_v13 = vmul.f32 1.442695, %v266_v12 }
 0x169   : > { %1066 = vpow2.f32 %v267_v13 }
 0x176   : > { %v1067_v14 = vpop.eup %1066 }
 0x177   : > { %v269_v15 = vsel %vm216_vm1, %v1067_v14, 0.0 }
 0x178   : > { %270 = vadd.xlane.f32.xlu0 %v269_v15 }
 0x18e   : > { %328 = vrot.lane.b32.xlu0 %v1153_v5, %s1093_s25 }
 0x201   : > { %v271_v18 = vpop.xlane.xlu0 %270 }
 0x202   : > { %1068 = vrcp.f32 %v271_v18 }
 0x205   : > { %v329_v24 = vpop.permute.xlu0 %328 }
 0x20f   : > { %v1069_v19 = vpop.eup %1068 }
 0x210   : > { %v273_v21 = vmul.f32 %v1069_v19, %v1067_v14 }
 0x212   : > { %v274_v23 = vpack.c.bf16 %v273_v21, %v273_v21 }
 0x214   : > { %986 = vmatmul.mubr.msk.bf16.vlgmr.msra.gmra.mxu1 %vm216_vm1, %v274_v23  ;;  %v944_v23 = vld [vmem:[%s1256_s2 + $0x8] sm:$0xf] }
 0x215   : > { %990 = vmatpush3.bf16.xpose.msra.mxu1 %v336_v22  ;;  %991 = vmatprep.mubr.msk.bf16.mxu1 %vm1091_vm0, %v1090_v0 }
 0x216   : > { %1001 = vmatprep.subr.bf16.mxu1 %v1090_v0 }
 0x21c   : > { %992 = vmatmul.mubr.msk.bf16.vlgmr.msra.gmra.mxu1 %vm216_vm1, %v329_v24  ;;  %v650_v24 = vsel %vm281_vm2, %v944_v23, 0 }
 0x21d   : > { %1003 = vmatprep.mubr.msk.bf16.mxu1 %vm1091_vm0, %v1090_v0  ;;  %1002 = vmatpush3.bf16.msra.mxu1 %v445_v42 }
 0x21e   : > { %1013 = vmatprep.subr.bf16.mxu1 %v1090_v0 }
 0x2d4   : > { %v319_v25 = vpop.f32.mrf.mxu1 }
 0x2d5   : > { %v325_v49 = vpack.c.bf16 %v319_v25, %v319_v25 }
 0x2d6   : > { %v987_v26 = vpop.f32.mrf.mxu1 }
 0x2d8   : > { %v322_v27 = vpop.f32.mrf.mxu1 }
 0x2da   : > { %v988_v28 = vpop.f32.mrf.mxu1 }
 0x2dc   : > { %v372_v29 = vpop.f32.mrf.mxu1 }
 0x2dd   : > { %v378_v30 = vsel %vm216_vm1, %v372_v29, -inf }
 0x2de   : > { %379 = vmax.xlane.f32.xlu1 %v378_v30  ;;  %v993_v31 = vpop.f32.mrf.mxu1 }
 0x2e0   : > { %v375_v32 = vpop.f32.mrf.mxu1 }
 0x2e2   : > { %v994_v33 = vpop.f32.mrf.mxu1 }
 0x2ef   : > { %390 = vrot.lane.b32.xlu1 %v1144_v2, %s1094_s26 }
 0x2f3   : > { %533 = vrot.lane.b32.xlu1 %v1153_v5, %s1095_s29 }
 0x367   : > { %v380_v34 = vpop.xlane.xlu1 %379 }
 0x368   : > { %v381_v35 = vsub.f32 %v372_v29, %v380_v34 }
 0x36a   : > { %v382_v36 = vmul.f32 1.442695, %v381_v35 }
 0x36b   : > { %v391_v39 = vpop.permute.xlu1 %390 }
 0x36c   : > { %1070 = vpow2.f32 %v382_v36  ;;  %v396_v40 = vsel %vm281_vm2, %v391_v39, 0 }
 0x36d   : > { %996 = vmatpush3.bf16.msra.mxu0 %v396_v40 }
 0x36e   : > { %1007 = vmatprep.subr.bf16.mxu0 %v1090_v0 }
 0x36f   : > { %v534_v58 = vpop.permute.xlu1 %533 }
 0x379   : > { %v1071_v37 = vpop.eup %1070 }
 0x37a   : > { %v384_v38 = vsel %vm216_vm1, %v1071_v37, 0.0 }
 0x37b   : > { %385 = vadd.xlane.f32.xlu0 %v384_v38 }
 0x391   : > { %535 = vrot.lane.b32.xlu0 %v1144_v2, %s1095_s29 }
 0x404   : > { %v386_v43 = vpop.xlane.xlu0 %385 }
 0x405   : > { %1072 = vrcp.f32 %v386_v43 }
 0x408   : > { %v536_v50 = vpop.permute.xlu0 %535 }
 0x409   : > { %v541_v53 = vsel %vm216_vm1, %v536_v50, 0 }
 0x412   : > { %v1073_v44 = vpop.eup %1072 }
 0x413   : > { %v388_v46 = vmul.f32 %v1073_v44, %v1071_v37 }
 0x415   : > { %v389_v47 = vpack.c.bf16 %v388_v46, %v388_v46 }
 0x417   : > { %998 = vmatmul.mubr.msk.bf16.vlgmr.msra.gmra.mxu0 %vm216_vm1, %v389_v47 }
 0x418   : > { %1008 = vmatpush3.bf16.msra.mxu0 %v491_v48  ;;  %1009 = vmatprep.mubr.msk.bf16.mxu0 %vm1091_vm0, %v1090_v0 }
 0x419   : > { %1019 = vmatprep.subr.bf16.mxu0 %v1090_v0 }
 0x41f   : > { %1010 = vmatmul.mubr.msk.bf16.vlgmr.msra.gmra.mxu0 %vm216_vm1, %v325_v49 }
 0x420   : > { %1021 = vmatprep.mubr.msk.bf16.mxu0 %vm1091_vm0, %v1090_v0 }
 0x4d7   : > { %v432_v51 = vpop.f32.mrf.mxu0 }
 0x4d8   : > { %v438_v52 = vpack.c.bf16 %v432_v51, %v432_v51 }
 0x4d9   : > { %v999_v54 = vpop.f32.mrf.mxu0 }
 0x4da   : > { %1004 = vmatmul.mubr.msk.bf16.vlgmr.msra.gmra.mxu1 %vm216_vm1, %v438_v52 }
 0x4db   : > { %1014 = vmatpush3.bf16.xpose.msra.mxu1 %v541_v53  ;;  %v435_v55 = vpop.f32.mrf.mxu0  ;;  %1015 = vmatprep.mubr.msk.bf16.mxu1 %vm1091_vm0, %v1090_v0 }
 0x4dc   : > { %1025 = vmatprep.subr.bf16.mxu1 %v1090_v0 }
 0x4dd   : > { %v1000_v56 = vpop.f32.mrf.mxu0 }
 0x4df   : > { %v1202_v57 = vpop.f32.mrf.mxu0 }
 0x4e1   : > { %v1011_v59 = vpop.f32.mrf.mxu0 }
 0x4e2   : > { %1016 = vmatmul.mubr.msk.bf16.vlgmr.msra.gmra.mxu1 %vm216_vm1, %v534_v58 }
 0x4e3   : > { %v530_v60 = vpop.f32.mrf.mxu0  ;;  %1027 = vmatprep.mubr.msk.bf16.mxu1 %vm1091_vm0, %v1090_v0  ;;  %1026 = vmatpush3.bf16.msra.mxu1 %v650_v24 }
 0x4e4   : > { %1037 = vmatprep.subr.bf16.mxu1 %v1090_v0 }
 0x4e5   : > { %v1012_v61 = vpop.f32.mrf.mxu0 }
 0x59a   : > { %v1207_v62 = vpop.f32.mrf.mxu1 }
 0x59b   : > { %v528_v41 = vadd.f32 %v1202_v57, %v1207_v62  ;;  %v950_v57 = vld [vmem:[%s1257_s3] ss:$0 sm:$0xff] }
 0x59c   : > { %v1005_v63 = vpop.f32.mrf.mxu1 }
 0x59e   : > { %v484_v1 = vpop.f32.mrf.mxu1 }
 0x5a0   : > { %v1006_v3 = vpop.f32.mrf.mxu1 }
 0x5a2   : > { %v577_v4 = vpop.f32.mrf.mxu1 }
 0x5a3   : > { %v583_v6 = vsel %vm216_vm1, %v577_v4, -inf }
 0x5a4   : > { %584 = vmax.xlane.f32.xlu1 %v583_v6  ;;  %v1017_v7 = vpop.f32.mrf.mxu1 }
 0x5a6   : > { %v580_v8 = vpop.f32.mrf.mxu1 }
 0x5a8   : > { %v1018_v9 = vpop.f32.mrf.mxu1 }
 0x5b5   : > { %595 = vrot.lane.b32.xlu1 %v1144_v2, %s1096_s6 }
 0x5b9   : > { %693 = vrot.lane.b32.xlu1 %v1153_v5, %s1097_s7 }
 0x62d   : > { %v585_v10 = vpop.xlane.xlu1 %584 }
 0x62e   : > { %v586_v11 = vsub.f32 %v577_v4, %v585_v10 }
 0x630   : > { %v587_v12 = vmul.f32 1.442695, %v586_v11 }
 0x631   : > { %v596_v15 = vpop.permute.xlu1 %595 }
 0x632   : > { %1074 = vpow2.f32 %v587_v12  ;;  %v601_v16 = vsel %vm281_vm2, %v596_v15, 0 }
 0x633   : > { %1020 = vmatpush3.bf16.msra.mxu0 %v601_v16 }
 0x634   : > { %1031 = vmatprep.subr.bf16.mxu0 %v1090_v0 }
 0x635   : > { %v694_v22 = vpop.permute.xlu1 %693 }
 0x63f   : > { %v1075_v13 = vpop.eup %1074 }
 0x640   : > { %v589_v14 = vsel %vm216_vm1, %v1075_v13, 0.0 }
 0x641   : > { %590 = vadd.xlane.f32.xlu0 %v589_v14 }
 0x657   : > { %695 = vrot.lane.b32.xlu0 %v1144_v2, %s1097_s7 }
 0x6ca   : > { %v591_v17 = vpop.xlane.xlu0 %590 }
 0x6cb   : > { %1076 = vrcp.f32 %v591_v17 }
 0x6ce   : > { %v696_v5 = vpop.permute.xlu0 %695 }
 0x6cf   : > { %v701_v20 = vsel %vm216_vm1, %v696_v5, 0 }
 0x6d8   : > { %v1077_v18 = vpop.eup %1076 }
 0x6d9   : > { %v593_v19 = vmul.f32 %v1077_v18, %v1075_v13 }
 0x6db   : > { %v594_v21 = vpack.c.bf16 %v593_v19, %v593_v19 }
 0x6dd   : > { %1022 = vmatmul.mubr.msk.bf16.vlgmr.msra.gmra.mxu0 %vm216_vm1, %v594_v21 }
 0x6de   : > { %1032 = vmatpush3.bf16.xpose.msra.mxu0 %v701_v20  ;;  %1033 = vmatprep.mubr.msk.bf16.mxu0 %vm1091_vm0, %v1090_v0 }
 0x6df   : > { %1043 = vmatprep.subr.bf16.mxu0 %v1090_v0 }
 0x6e5   : > { %1034 = vmatmul.mubr.msk.bf16.vlgmr.msra.gmra.mxu0 %vm216_vm1, %v694_v22 }
 0x6e6   : > { %1045 = vmatprep.mubr.msk.bf16.mxu0 %vm1091_vm0, %v1090_v0 }
 0x79d   : > { %v637_v25 = vpop.f32.mrf.mxu0 }
 0x79e   : > { %v643_v26 = vpack.c.bf16 %v637_v25, %v637_v25 }
 0x79f   : > { %v1023_v27 = vpop.f32.mrf.mxu0 }
 0x7a0   : > { %1028 = vmatmul.mubr.msk.bf16.vlgmr.msra.gmra.mxu1 %vm216_vm1, %v643_v26 }
 0x7a1   : > { %v640_v28 = vpop.f32.mrf.mxu0  ;;  %1039 = vmatprep.mubr.msk.bf16.mxu1 %vm1091_vm0, %v1090_v0 }
 0x7a3   : > { %v1024_v29 = vpop.f32.mrf.mxu0 }
 0x7a5   : > { %v737_v30 = vpop.f32.mrf.mxu0 }
 0x7a6   : > { %v743_v31 = vsel %vm216_vm1, %v737_v30, -inf }
 0x7a7   : > { %744 = vmax.xlane.f32.xlu1 %v743_v31  ;;  %v1035_v32 = vpop.f32.mrf.mxu0 }
 0x7a9   : > { %v740_v33 = vpop.f32.mrf.mxu0 }
 0x7ab   : > { %v1036_v34 = vpop.f32.mrf.mxu0 }
 0x7b8   : > { %755 = vrot.lane.b32.xlu1 %v1144_v2, %s1098_s10  ;;  %v948_v2 = vld [vmem:[%s1256_s2 + $0xc] sm:$0xf] }
 0x7b9   : > { %v810_v44 = vsel %vm281_vm2, %v948_v2, 0 }
 0x7ba   : > { %1044 = vmatpush3.bf16.msra.mxu0 %v810_v44 }
 0x830   : > { %v745_v35 = vpop.xlane.xlu1 %744 }
 0x831   : > { %v746_v36 = vsub.f32 %v737_v30, %v745_v35 }
 0x833   : > { %v747_v37 = vmul.f32 1.442695, %v746_v36 }
 0x834   : > { %v756_v0 = vpop.permute.xlu1 %755 }
 0x835   : > { %1078 = vpow2.f32 %v747_v37  ;;  %v761_v40 = vsel %vm281_vm2, %v756_v0, 0 }
 0x836   : > { %1038 = vmatpush3.bf16.msra.mxu1 %v761_v40 }
 0x842   : > { %v1079_v38 = vpop.eup %1078 }
 0x843   : > { %v749_v39 = vsel %vm216_vm1, %v1079_v38, 0.0 }
 0x844   : > { %750 = vadd.xlane.f32.xlu0 %v749_v39 }
 0x860   : > { %v686_v42 = vpop.f32.mrf.mxu1 }
 0x861   : > { %v692_v43 = vadd.f32 %v686_v42, %v528_v41 }
 0x862   : > { %v1029_v45 = vpop.f32.mrf.mxu1 }
 0x864   : > { %v689_v46 = vpop.f32.mrf.mxu1 }
 0x866   : > { %v1030_v47 = vpop.f32.mrf.mxu1 }
 0x8cd   : > { %v751_v48 = vpop.xlane.xlu0 %750 }
 0x8ce   : > { %1080 = vrcp.f32 %v751_v48 }
 0x8db   : > { %v1081_v49 = vpop.eup %1080 }
 0x8dc   : > { %v753_v50 = vmul.f32 %v1081_v49, %v1079_v38 }
 0x8de   : > { %v754_v51 = vpack.c.bf16 %v753_v50, %v753_v50 }
 0x8e0   : > { %1040 = vmatmul.mubr.msk.bf16.vlgmr.msra.gmra.mxu1 %vm216_vm1, %v754_v51 }
 0x9a0   : > { %v797_v52 = vpop.f32.mrf.mxu1 }
 0x9a1   : > { %v803_v53 = vpack.c.bf16 %v797_v52, %v797_v52 }
 0x9a2   : > { %v1041_v54 = vpop.f32.mrf.mxu1 }
 0x9a3   : > { %1046 = vmatmul.mubr.msk.bf16.vlgmr.msra.gmra.mxu0 %vm216_vm1, %v803_v53 }
 0x9a4   : > { %v800_v55 = vpop.f32.mrf.mxu1 }
 0x9a6   : > { %v1042_v56 = vpop.f32.mrf.mxu1 }
 0xa63   : > { %v846_v58 = vpop.f32.mrf.mxu0 }
 0xa64   : > { %v852_v59 = vadd.f32 %v846_v58, %v692_v43 }
 0xa65   : > { %v1047_v60 = vpop.f32.mrf.mxu0 }
 0xa66   : > { %v859_v61 = vadd.f32 %v950_v57, %v852_v59 }
 0xa67   : > { %v849_v62 = vpop.f32.mrf.mxu0 }
 0xa68   : > { %861 = vst.msk [vmem:[%s209_s19] sm:$0xff] %vm860_vm3, %v859_v61 }
 0xa69   : > { %v1048_v63 = vpop.f32.mrf.mxu0 }
 0xa6a PF: > { %s14_s15 = sadd.s32 1, %s1088_s15  }
 0xa6b   : > { %p11_p4 = scmp.ge.s32.totalorder %s14_s15, 4  }
 0xa6d   :  { %13 = sbr.rel (!%p11_p4) target bundleno = 1 (0x1), region = 72 }

// kernel: transformer_decoder_forward.16
= control target key start
LH: loop header
LB: loop body
LE: loop exit
PB: predicated region body
PF: predicated region fallthrough
CT: control target
= control target key end

     0   :  { %s1066_s13 = smov 0   ;;  %s1187_s0 = inlined_call_operand.vmem [shape: f32[4,4,32], index: 0, kind: input, shape index: {}]   ;;  %s1188_s1 = inlined_call_operand.vmem [shape: f32[4,4,32], index: 1, kind: input, shape index: {}]   ;;  %s1189_s2 = inlined_call_operand.vmem [shape: bf16[3,32,32], index: 2, kind: input, shape index: {}]   ;;  %s1190_s3 = inlined_call_operand.vmem [shape: f32[1,32], index: 3, kind: input, shape index: {}]   ;;  %s1191_s4 = inlined_call_operand.vmem [shape: f32[1,32], index: 4, kind: input, shape index: {}]   ;;  %s1192_s5 = inlined_call_operand.vmem [shape: f32[1,32], index: 5, kind: input, shape index: {}]   ;;  %s1193_s6 = inlined_call_operand.vmem [shape: bf16[32,128], index: 6, kind: input, shape index: {}]   ;;  %s1194_s7 = inlined_call_operand.vmem [shape: f32[1,128], index: 7, kind: input, shape index: {}]   ;;  %s1195_s8 = inlined_call_operand.vmem [shape: bf16[128,32], index: 8, kind: input, shape index: {}]   ;;  %s1196_s9 = inlined_call_operand.vmem [shape: f32[1,32], index: 9, kind: input, shape index: {}]   ;;  %s1197_s10 = inlined_call_operand.vmem [shape: f32[4,4,32], index: 10, kind: output, shape index: {}]  }
   0x1 LB: > { %s857_s14 = sadd.s32 4294967295, %s1007_s13   ;;  %p861_p0 = scmp.ge.s32.totalorder %s1007_s13, 1  ;;  %s1007_s13 = sphi %s1066_s13, %s20_s13  }
   0x2   : > { %p320_p1 = scmp.lt.s32.totalorder %s1007_s13, 5 }
   0x4   : > { %p321_p2 = pnand %p861_p0, %p320_p1 }
   0x5   : > { %p360_p3 = scmp.lt.s32.totalorder (!%p321_p2), %s857_s14, 3 }
   0x6   : > { %324 = sbr.rel (%p321_p2) target bundleno = 943 (0x3af), region = 60 }
   0xb   : > { %v983_v0 = vld [vmem:[%s1189_s2 + $0x8] sm:$0xff]   ;;  %v1009_v1 = vmov 0.0   ;;  %v984_v2 = vld [vmem:[%s1189_s2] sm:$0xff]   ;;  %vm1010_vm0 = vmmov 0   ;;  %s1199_s14 = smov (!%p360_p3, %s857_s14), 3  ;;  %vm377_vm1 = vcmask 1040384  }
   0xc   : > { %921 = vmatprep.subr.bf16.mxu1 %v1009_v1  ;;  %953 = vmatprep.subr.bf16.mxu0 %v1009_v1  ;;  %s1087_s19 = sshll.u32 %s1199_s14, 2  ;;  %vm407_vm2 = vcmask 261120   ;;  %v985_v6 = vld [vmem:[%s1189_s2 + $0x18] sm:$0xff]   ;;  %v986_v8 = vld [vmem:[%s1189_s2 + $0x10] sm:$0xff]   ;;  %v987_v10 = vld [vmem:[%s1189_s2 + $0x28] sm:$0xff]   ;;  %vm382_vm3 = vcmask 1042432  }
   0xd   : > { %922 = vmatpush3.bf16.msra.mxu1 %v983_v0  ;;  %925 = vmatprep.mubr.msk.bf16.mxu1 %vm1010_vm0, %v1009_v1  ;;  %s363_s22 = scalar_lea.vmem %s1187_s0, %s1087_s19  ;;  %v988_v12 = vld [vmem:[%s1189_s2 + $0x20] sm:$0xff]   ;;  %vm578_vm4 = vcmask 257024   ;;  %v989_v38 = vld [vmem:[%s1193_s6 + $0x8] sm:$0xff]   ;;  %v991_v40 = vld [vmem:[%s1195_s8 + $0x38] sm:$0xff]   ;;  %s367_s25 = scalar_lea.vmem %s1188_s1, %s1087_s19 }
   0xe   : > { %923 = vmatprep.subr.bf16.mxu1 %v1009_v1  ;;  %969 = vmatprep.mubr.msk.bf16.mxu0 %vm1010_vm0, %v1009_v1  ;;  %v373_v3 = vld [vmem:[%s363_s22] sm:$0xf]  ;;  %v992_v41 = vld [vmem:[%s1195_s8 + $0x30] sm:$0xff]   ;;  %v993_v42 = vld [vmem:[%s1195_s8 + $0x28] sm:$0xff]   ;;  %s371_s30 = scalar_lea.vmem %s1197_s10, %s1087_s19 }
   0xf   : > { %v375_v4 = vrot.slane %v373_v3, 7  ;;  %v385_v9 = vpack.c.bf16 %v373_v3, %v373_v3  ;;  %v380_v11 = vrot.slane %v373_v3, 1  ;;  %v882_v25 = vld [vmem:[%s1190_s3] ss:$0 sm:$0xff]  ;;  %954 = vmatpush3.bf16.msra.mxu0 %v991_v40  ;;  %v995_v44 = vld [vmem:[%s1195_s8 + $0x18] sm:$0xff]   ;;  %v996_v45 = vld [vmem:[%s1195_s8 + $0x10] sm:$0xff]  }
  0x10   : > { %v990_v39 = vld [vmem:[%s1193_s6] sm:$0xff]   ;;  %955 = vmatprep.subr.bf16.mxu0 %v1009_v1  ;;  %v997_v56 = vld [vmem:[%s1195_s8 + $0x8] sm:$0xff]  }
  0x11   : > { %924 = vmatpush3.bf16.msra.mxu1 %v984_v2  ;;  %v378_v5 = vsel %vm377_vm1, 0.0, %v375_v4  ;;  %v383_v13 = vsel %vm382_vm3, %v380_v11, 0.0  ;;  %v994_v43 = vld [vmem:[%s1195_s8 + $0x20] sm:$0xff]  }
  0x12   : > { %929 = vmatprep.subr.bf16.mxu1 %v1009_v1  ;;  %v379_v7 = vpack.c.bf16 %v378_v5, %v378_v5  ;;  %v384_v14 = vpack.c.bf16 %v383_v13, %v383_v13  ;;  %v883_v50 = vld [vmem:[%s1191_s4] ss:$0 sm:$0xff] }
  0x13   : > { %956 = vmatpush3.bf16.msra.mxu0 %v992_v41  ;;  %v884_v52 = vld [vmem:[%s1192_s5] ss:$0 sm:$0xff] }
  0x14   : > { %926 = vmatmul.mubr.msk.bf16.vlgmr.msra.gmra.mxu1 %vm407_vm2, %v379_v7  ;;  %957 = vmatprep.subr.bf16.mxu0 %v1009_v1  ;;  %v998_v57 = vld [vmem:[%s1195_s8] sm:$0xff]  }
  0x15   : > { %930 = vmatpush3.bf16.msra.mxu1 %v985_v6  ;;  %933 = vmatprep.mubr.msk.bf16.mxu1 %vm1010_vm0, %v1009_v1  ;;  %v885_v58 = vld [vmem:[%s1194_s7] ss:$0 sm:$0xff] }
  0x16   : > { %931 = vmatprep.subr.bf16.mxu1 %v1009_v1  ;;  %v897_v5 = vld [vmem:[%s1196_s9] ss:$0 sm:$0xff] }
  0x17   : > { %958 = vmatpush3.bf16.msra.mxu0 %v993_v42 }
  0x18   : > { %959 = vmatprep.subr.bf16.mxu0 %v1009_v1 }
  0x19   : > { %932 = vmatpush3.bf16.msra.mxu1 %v986_v8 }
  0x1a   : > { %937 = vmatprep.subr.bf16.mxu1 %v1009_v1 }
  0x1b   : > { %960 = vmatpush3.bf16.msra.mxu0 %v994_v43 }
  0x1c   : > { %934 = vmatmul.mubr.msk.bf16.vlgmr.msra.gmra.mxu1 %vm407_vm2, %v385_v9  ;;  %961 = vmatprep.subr.bf16.mxu0 %v1009_v1 }
  0x1d   : > { %938 = vmatpush3.bf16.msra.mxu1 %v987_v10  ;;  %941 = vmatprep.mubr.msk.bf16.mxu1 %vm1010_vm0, %v1009_v1 }
  0x1e   : > { %939 = vmatprep.subr.bf16.mxu1 %v1009_v1 }
  0x1f   : > { %962 = vmatpush3.bf16.msra.mxu0 %v995_v44 }
  0x20   : > { %963 = vmatprep.subr.bf16.mxu0 %v1009_v1 }
  0x21   : > { %940 = vmatpush3.bf16.msra.mxu1 %v988_v12 }
  0x22   : > { %945 = vmatprep.subr.bf16.mxu1 %v1009_v1 }
  0x23   : > { %964 = vmatpush3.bf16.msra.mxu0 %v996_v45 }
  0x24   : > { %942 = vmatmul.mubr.msk.bf16.vlgmr.msra.gmra.mxu1 %vm407_vm2, %v384_v14  ;;  %965 = vmatprep.subr.bf16.mxu0 %v1009_v1 }
  0x25   : > { %949 = vmatprep.mubr.msk.bf16.mxu1 %vm1010_vm0, %v1009_v1  ;;  %946 = vmatpush3.bf16.msra.mxu1 %v989_v38 }
  0x26   : > { %947 = vmatprep.subr.bf16.mxu1 %v1009_v1 }
  0x27   : > { %966 = vmatpush3.bf16.msra.mxu0 %v997_v56 }
  0x28   : > { %967 = vmatprep.subr.bf16.mxu0 %v1009_v1  ;;  %v576_v1 = vld [vmem:[%s367_s25] sm:$0xf] }
  0x29   : > { %948 = vmatpush3.bf16.msra.mxu1 %v990_v39 }
  0x2b   : > { %968 = vmatpush3.bf16.msra.mxu0 %v998_v57 }
  0xd4   : > { %v445_v15 = vpop.f32.mrf.mxu1 }
  0xd6   : > { %v927_v16 = vpop.f32.mrf.mxu1 }
  0xd8   : > { %v448_v17 = vpop.f32.mrf.mxu1 }
  0xda   : > { %v928_v18 = vpop.f32.mrf.mxu1 }
  0xdc   : > { %v500_v19 = vpop.f32.mrf.mxu1 }
  0xdd   : > { %v501_v23 = vadd.f32 %v500_v19, %v445_v15 }
  0xde   : > { %v935_v20 = vpop.f32.mrf.mxu1 }
  0xe0   : > { %v503_v21 = vpop.f32.mrf.mxu1 }
  0xe2   : > { %v936_v22 = vpop.f32.mrf.mxu1 }
  0xe4   : > { %v560_v24 = vpop.f32.mrf.mxu1 }
  0xe5   : > { %v566_v26 = vadd.f32 %v560_v24, %v501_v23 }
  0xe6   : > { %v943_v27 = vpop.f32.mrf.mxu1 }
  0xe7   : > { %v574_v28 = vadd.f32 %v882_v25, %v566_v26 }
  0xe8   : > { %v563_v29 = vpop.f32.mrf.mxu1 }
  0xe9   : > { %v575_v30 = vmax.f32 %v574_v28, 0.0 }
  0xea   : > { %v944_v31 = vpop.f32.mrf.mxu1 }
  0xeb   : > { %v579_v32 = vsel %vm578_vm4, %v575_v30, 0.0  ;;  %v577_v3 = vadd.f32 %v576_v1, %v575_v30 }
  0xec   : > { %580 = vadd.xlane.f32.xlu0 %v579_v32 }
 0x175   : > { %v581_v33 = vpop.xlane.xlu0 %580 }
 0x176   : > { %v583_v34 = vmul.f32 0.03125, %v581_v33 }
 0x178   : > { %v584_v35 = vsub.f32 %v575_v30, %v583_v34 }
 0x17a   : > { %v585_v36 = vmul.f32 %v584_v35, %v584_v35 }
 0x17c   : > { %v586_v37 = vsel %vm578_vm4, %v585_v36, 0.0 }
 0x17d   : > { %587 = vadd.xlane.f32.xlu0 %v586_v37 }
 0x206   : > { %v588_v46 = vpop.xlane.xlu0 %587 }
 0x207   : > { %v589_v47 = vmul.f32 0.03125, %v588_v46 }
 0x209   : > { %v590_v48 = vadd.f32 1e-05, %v589_v47 }
 0x20b   : > { %999 = vrsqrt.f32 %v590_v48 }
 0x218   : > { %v1000_v49 = vpop.eup %999 }
 0x219   : > { %v592_v51 = vmul.f32 %v1000_v49, %v584_v35 }
 0x21b   : > { %v600_v53 = vmul.f32 %v883_v50, %v592_v51 }
 0x21d   : > { %v608_v54 = vadd.f32 %v884_v52, %v600_v53 }
 0x21f   : > { %v609_v55 = vpack.c.bf16 %v608_v54, %v608_v54 }
 0x221   : > { %950 = vmatmul.mubr.msk.bf16.vlgmr.msra.gmra.mxu1 %vm407_vm2, %v609_v55 }
 0x2e1   : > { %v670_v59 = vpop.f32.mrf.mxu1 }
 0x2e2   : > { %v671_v60 = vadd.f32 %v885_v58, %v670_v59 }
 0x2e3   : > { %v951_v61 = vpop.f32.mrf.mxu1 }
 0x2e4   : > { %v676_v62 = vmax.f32 %v671_v60, 0.0 }
 0x2e5   : > { %v673_v63 = vpop.f32.mrf.mxu1 }
 0x2e6   : > { %v677_v0 = vpack.c.bf16 %v676_v62, %v676_v62 }
 0x2e7   : > { %v952_v2 = vpop.f32.mrf.mxu1 }
 0x2e8   : > { %970 = vmatmul.mubr.bf16.vlgmr.msra.gmra.mxu0 %v677_v0 }
 0x3a8   : > { %v776_v4 = vpop.f32.mrf.mxu0 }
 0x3a9   : > { %v782_v6 = vadd.f32 %v776_v4, %v577_v3 }
 0x3aa   : > { %v971_v7 = vpop.f32.mrf.mxu0 }
 0x3ab   : > { %v790_v8 = vadd.f32 %v897_v5, %v782_v6 }
 0x3ac   : > { %v779_v9 = vpop.f32.mrf.mxu0 }
 0x3ad   : > { %791 = vst.msk [vmem:[%s371_s30] sm:$0xf] %vm578_vm4, %v790_v8 }
 0x3ae   : > { %v972_v10 = vpop.f32.mrf.mxu0 }
 0x3af PF: > { %s20_s13 = sadd.s32 1, %s1007_s13  }
 0x3b0   : > { %p17_p4 = scmp.ge.s32.totalorder %s20_s13, 6  }
 0x3b2   :  { %19 = sbr.rel (!%p17_p4) target bundleno = 1 (0x1), region = 95 }

// kernel: transformer_decoder_forward.17
= control target key start
LH: loop header
LB: loop body
LE: loop exit
PB: predicated region body
PF: predicated region fallthrough
CT: control target
= control target key end

     0   :  { %vm23_vm0 = vcmask 261120   ;;  %v169_v14 = vmov 0.0   ;;  %vm170_vm1 = vmmov 0   ;;  %vm137_vm2 = vcmask 195584   ;;  %s233_s0 = inlined_call_operand.vmem [shape: f32[16,32], index: 0, kind: input, shape index: {}]   ;;  %s234_s3 = inlined_call_operand.vmem [shape: bf16[32,24], index: 3, kind: input, shape index: {}]   ;;  %s235_s1 = inlined_call_operand.vmem [shape: f32[1,32], index: 1, kind: input, shape index: {}]   ;;  %s236_s2 = inlined_call_operand.vmem [shape: f32[1,32], index: 2, kind: input, shape index: {}]   ;;  %s237_s4 = inlined_call_operand.vmem [shape: f32[1,24], index: 4, kind: input, shape index: {}]   ;;  %s238_s5 = inlined_call_operand.vmem [shape: f32[16,24], index: 5, kind: output, shape index: {}]  }
   0x1   :  { %v21_v0 = vld [vmem:[%s233_s0] sm:$0xff]  ;;  %v22_v1 = vld [vmem:[%s233_s0 + $0x8] sm:$0xff]  ;;  %153 = vmatprep.subr.bf16.mxu0 %v169_v14  ;;  %157 = vmatprep.mubr.msk.bf16.mxu0 %vm170_vm1, %v169_v14 }
   0x2   :  { %v24_v2 = vsel %vm23_vm0, %v21_v0, 0.0  ;;  %v27_v3 = vsel %vm23_vm0, %v22_v1, 0.0  ;;  %v163_v15 = vld [vmem:[%s234_s3 + $0x8] sm:$0xff]   ;;  %v164_v16 = vld [vmem:[%s234_s3] sm:$0xff]  }
   0x3   :  { %25 = vadd.xlane.f32.xlu0 %v24_v2  ;;  %154 = vmatpush3.bf16.msra.mxu0 %v163_v15  ;;  %v144_v25 = vld [vmem:[%s235_s1] ss:$0 sm:$0xff] }
   0x4   :  { %155 = vmatprep.subr.bf16.mxu0 %v169_v14  ;;  %v145_v29 = vld [vmem:[%s236_s2] ss:$0 sm:$0xff] }
   0x5   :  { %v146_v34 = vld [vmem:[%s237_s4] ss:$0 sm:$0xff] }
   0x7   :  { %28 = vadd.xlane.f32.xlu0 %v27_v3  ;;  %156 = vmatpush3.bf16.msra.mxu0 %v164_v16 }
  0x8c   :  { %v26_v4 = vpop.xlane.xlu0 %25 }
  0x8d   :  { %v31_v5 = vmul.f32 0.03125, %v26_v4 }
  0x8f   :  { %v33_v6 = vsub.f32 %v21_v0, %v31_v5 }
  0x90   :  { %v29_v7 = vpop.xlane.xlu0 %28 }
  0x91   :  { %v32_v8 = vmul.f32 0.03125, %v29_v7  ;;  %v35_v9 = vmul.f32 %v33_v6, %v33_v6 }
  0x93   :  { %v34_v10 = vsub.f32 %v22_v1, %v32_v8  ;;  %v37_v11 = vsel %vm23_vm0, %v35_v9, 0.0 }
  0x94   :  { %38 = vadd.xlane.f32.xlu1 %v37_v11 }
  0x95   :  { %v36_v12 = vmul.f32 %v34_v10, %v34_v10 }
  0x97   :  { %v40_v13 = vsel %vm23_vm0, %v36_v12, 0.0 }
  0x98   :  { %41 = vadd.xlane.f32.xlu1 %v40_v13 }
 0x11d   :  { %v39_v17 = vpop.xlane.xlu1 %38 }
 0x11e   :  { %v43_v18 = vmul.f32 0.03125, %v39_v17 }
 0x120   :  { %v45_v19 = vadd.f32 1e-05, %v43_v18 }
 0x121   :  { %v42_v20 = vpop.xlane.xlu1 %41 }
 0x122   :  { %165 = vrsqrt.f32 %v45_v19  ;;  %v44_v21 = vmul.f32 0.03125, %v42_v20 }
 0x124   :  { %v46_v22 = vadd.f32 1e-05, %v44_v21 }
 0x126   :  { %167 = vrsqrt.f32 %v46_v22 }
 0x12f   :  { %v166_v23 = vpop.eup %165 }
 0x130   :  { %v49_v24 = vmul.f32 %v166_v23, %v33_v6 }
 0x132   :  { %v58_v28 = vmul.f32 %v144_v25, %v49_v24 }
 0x133   :  { %v168_v26 = vpop.eup %167 }
 0x134   :  { %v50_v27 = vmul.f32 %v168_v26, %v34_v10  ;;  %v67_v31 = vadd.f32 %v145_v29, %v58_v28 }
 0x136   :  { %v59_v30 = vmul.f32 %v144_v25, %v50_v27 }
 0x138   :  { %v68_v32 = vadd.f32 %v145_v29, %v59_v30 }
 0x13a   :  { %v69_v33 = vpack.c.bf16 %v68_v32, %v67_v31 }
 0x13c   :  { %158 = vmatmul.mubr.msk.bf16.vlgmr.msra.gmra.mxu0 %vm23_vm0, %v69_v33 }
 0x1fc   :  { %v130_v35 = vpop.f32.mrf.mxu0 }
 0x1fd   :  { %v131_v36 = vadd.f32 %v146_v34, %v130_v35 }
 0x1fe   :  { %v159_v37 = vpop.f32.mrf.mxu0 }
 0x1ff   :  { %138 = vst.msk [vmem:[%s238_s5] sm:$0xff] %vm137_vm2, %v131_v36 }
 0x200   :  { %v133_v38 = vpop.f32.mrf.mxu0 }
 0x201   :  { %v134_v39 = vadd.f32 %v146_v34, %v133_v38 }
 0x202   :  { %v160_v40 = vpop.f32.mrf.mxu0 }
 0x203   :  { %139 = vst.msk [vmem:[%s238_s5 + $0x8] sm:$0xff] %vm137_vm2, %v134_v39 }

// kernel: transformer_decoder_forward.25
= control target key start
LH: loop header
LB: loop body
LE: loop exit
PB: predicated region body
PF: predicated region fallthrough
CT: control target
= control target key end

     0   :  { %vm17_vm0 = vcmask 261120   ;;  %s156_s0 = inlined_call_operand.vmem [shape: f32[16,32], index: 0, kind: input, shape index: {}]   ;;  %s157_s1 = inlined_call_operand.vmem [shape: f32[1,32], index: 1, kind: input, shape index: {}]   ;;  %s158_s2 = inlined_call_operand.vmem [shape: f32[1,32], index: 2, kind: input, shape index: {}]   ;;  %s159_s3 = inlined_call_operand.hbm [shape: f32[16,32], index: 3, kind: output, shape index: {}]  }
   0x1   :  { %v15_v0 = vld [vmem:[%s156_s0] sm:$0xff]  ;;  %v16_v1 = vld [vmem:[%s156_s0 + $0x8] sm:$0xff] }
   0x2   :  { %8 = vsyncpa [#allocation3], 0  ;;  %v18_v2 = vsel %vm17_vm0, %v15_v0, 0.0  ;;  %v21_v3 = vsel %vm17_vm0, %v16_v1, 0.0  ;;  %v81_v21 = vld [vmem:[%s157_s1] ss:$0 sm:$0xff] }
   0x3   :  { %19 = vadd.xlane.f32.xlu0 %v18_v2  ;;  %v82_v23 = vld [vmem:[%s158_s2] ss:$0 sm:$0xff]  ;;  %s112_s19 = smov [#allocation2]  }
   0x4   :  { %s70_s20 = sshll.u32 %s112_s19, 4  ;;  %s71_s20 = int_to_ptr.vmem [resolvable:$true] %s70_s20 }
   0x5   :  { %s90_s21 = scalar_lea.vmem %s71_s20, 256  ;;  %p95_p1 = scmp.lt.s32.totalorder %s71_s20, %s71_s20 }
   0x6   :  { %p91_p0 = scmp.ne.s32.totalorder %s71_s20, %s90_s21  ;;  %p96_p2 = scmp.lt.s32.totalorder %s90_s21, %s90_s21 }
   0x7   :  { %22 = vadd.xlane.f32.xlu0 %v21_v3 }
   0x8   :  { %p97_p3 = por %p96_p2, %p95_p1 }
   0xa   :  { %p98_p4 = pnand %p97_p3, %p91_p0 }
  0x8c   :  { %v20_v4 = vpop.xlane.xlu0 %19 }
  0x8d   :  { %v25_v5 = vmul.f32 0.03125, %v20_v4 }
  0x8f   :  { %v27_v6 = vsub.f32 %v15_v0, %v25_v5 }
  0x90   :  { %v23_v7 = vpop.xlane.xlu0 %22 }
  0x91   :  { %v26_v8 = vmul.f32 0.03125, %v23_v7  ;;  %v29_v9 = vmul.f32 %v27_v6, %v27_v6 }
  0x93   :  { %v28_v10 = vsub.f32 %v16_v1, %v26_v8  ;;  %v31_v11 = vsel %vm17_vm0, %v29_v9, 0.0 }
  0x94   :  { %32 = vadd.xlane.f32.xlu1 %v31_v11 }
  0x95   :  { %v30_v12 = vmul.f32 %v28_v10, %v28_v10 }
  0x97   :  { %v34_v13 = vsel %vm17_vm0, %v30_v12, 0.0 }
  0x98   :  { %35 = vadd.xlane.f32.xlu1 %v34_v13 }
 0x11d   :  { %v33_v14 = vpop.xlane.xlu1 %32 }
 0x11e   :  { %v37_v15 = vmul.f32 0.03125, %v33_v14 }
 0x120   :  { %v39_v16 = vadd.f32 1e-05, %v37_v15 }
 0x121   :  { %v36_v17 = vpop.xlane.xlu1 %35 }
 0x122   :  { %86 = vrsqrt.f32 %v39_v16  ;;  %v38_v18 = vmul.f32 0.03125, %v36_v17 }
 0x124   :  { %v40_v19 = vadd.f32 1e-05, %v38_v18 }
 0x126   :  { %88 = vrsqrt.f32 %v40_v19 }
 0x12f   :  { %v87_v20 = vpop.eup %86 }
 0x130   :  { %v43_v22 = vmul.f32 %v87_v20, %v27_v6 }
 0x132   :  { %v52_v24 = vmul.f32 %v81_v21, %v43_v22 }
 0x133   :  { %v89_v25 = vpop.eup %88 }
 0x134   :  { %v44_v26 = vmul.f32 %v89_v25, %v28_v10  ;;  %v61_v27 = vadd.f32 %v82_v23, %v52_v24 }
 0x136   :  { %v53_v28 = vmul.f32 %v81_v21, %v44_v26  ;;  %63 = vst.msk [vmem:[#allocation2] sm:$0xff] %vm17_vm0, %v61_v27 }
 0x138   :  { %v62_v29 = vadd.f32 %v82_v23, %v53_v28 }
 0x13a   :  { %64 = vst.msk [vmem:[#allocation2 + $0x8] sm:$0xff] %vm17_vm0, %v62_v29 }
 0x13b   :  { %101 = shalt.err (!%p98_p4)
}
 0x13c   :  { %s113_s1 = smov 128   ;;  %s114_s2 = smov 8  }
 0x13d   :  { %76 = dma.vmem_to_hbm [thread:$0]  %s71_s20, 256, %s159_s3, [#allocation3], %s113_s1, %s113_s1, %s114_s2  }
 0x13e   :  { %110 = dma.done.wait [#allocation3], 256  }
 0x13f   :  { %111 = vsyncadd [#allocation3], 4294967040 }
 0x140   :  { %80 = vsyncpa [#allocation3], 1 }

// kernel: transformer_decoder_forward.18
= control target key start
LH: loop header
LB: loop body
LE: loop exit
PB: predicated region body
PF: predicated region fallthrough
CT: control target
= control target key end

     0   :  { %s1136_s15 = smov 0   ;;  %s1264_s0 = inlined_call_operand.vmem [shape: f32[4,4,24], index: 0, kind: input, shape index: {}]   ;;  %s1265_s1 = inlined_call_operand.vmem [shape: f32[4,4,32], index: 1, kind: input, shape index: {}]   ;;  %s1266_s2 = inlined_call_operand.vmem [shape: bf16[4,2,32], index: 2, kind: input, shape index: {}]   ;;  %s1267_s3 = inlined_call_operand.vmem [shape: f32[1,32], index: 3, kind: input, shape index: {}]   ;;  %s1268_s4 = inlined_call_operand.vmem [shape: f32[4,4,32], index: 4, kind: output, shape index: {}]  }
   0x1 LB: > { %s931_s16 = sadd.s32 4294967295, %s1096_s15   ;;  %p935_p0 = scmp.ge.s32.totalorder %s1096_s15, 1  ;;  %s1096_s15 = sphi %s1136_s15, %s14_s15  }
   0x2   : > { %p170_p1 = scmp.lt.s32.totalorder %s1096_s15, 5 }
   0x4   : > { %p171_p2 = pnand %p935_p0, %p170_p1 }
   0x5   : > { %p198_p3 = scmp.lt.s32.totalorder (!%p171_p2), %s931_s16, 3  ;;  %s1100_s21 = smov (!%p171_p2), 120  }
   0x6   : > { %174 = sbr.rel (%p171_p2) target bundleno = 2782 (0xade), region = 36  ;;  %s1101_s22 = smov (!%p171_p2), 112  }
   0x7   : > { %s1102_s23 = smov (!%p171_p2), 118   ;;  %s1103_s24 = smov (!%p171_p2), 126  }
   0x8   : > { %s1104_s25 = smov (!%p171_p2), 110   ;;  %s1105_s28 = smov (!%p171_p2), 116  }
   0x9   : > { %s1106_s29 = smov (!%p171_p2), 124   ;;  %s1107_s6 = smov (!%p171_p2), 108  }
   0xa   : > { %s1108_s7 = smov (!%p171_p2), 114   ;;  %s1109_s8 = smov (!%p171_p2), 122  }
   0xb   : > { %v1098_v0 = vmov 0.0   ;;  %vm1099_vm0 = vmmov 0   ;;  %s1270_s16 = smov (!%p198_p3, %s931_s16), 3  ;;  %vm217_vm1 = vcmask 15360   ;;  %vm264_vm2 = vcmask 27648   ;;  %s1110_s11 = smov 106  }
   0xc   : > { %981 = vmatprep.subr.bf16.mxu0 %v1098_v0  ;;  %983 = vmatprep.mubr.msk.bf16.mxu0 %vm1099_vm0, %v1098_v0  ;;  %s1150_s17 = sshll.u32 %s1270_s16, 2  ;;  %vm283_vm3 = vcmask 1041408   ;;  %vm279_vm4 = vcmask 31744   ;;  %vm445_vm5 = vcmask 1040384   ;;  %v943_v38 = vld [vmem:[%s1266_s2 + $0x1] sm:$0x1] }
   0xd   : > { %987 = vmatprep.subr.bf16.mxu1 %v1098_v0  ;;  %989 = vmatprep.mubr.msk.bf16.mxu1 %vm1099_vm0, %v1098_v0  ;;  %s201_s20 = scalar_lea.vmem %s1264_s0, %s1150_s17  ;;  %v447_v39 = vsel %vm445_vm5, %v943_v38, 0  ;;  %v328_v44 = vld [vmem:[%s1266_s2] sm:$0x1]  ;;  %s205_s18 = scalar_lea.vmem %s1265_s1, %s1150_s17  ;;  %vm864_vm6 = vcmask 257024  }
   0xe   : > { %v211_v1 = vld [vmem:[%s201_s20] sm:$0xf]  ;;  %v493_v47 = vsel %vm445_vm5, %v328_v44, 0 }
   0xf   : > { %v1156_v2 = vpack.c.bf16 %v211_v1, %v211_v1 }
  0x11   : > { %215 = vrot.lane.b32.xlu0 %v1156_v2, %s1100_s21  ;;  %277 = vrot.lane.b32.xlu1 %v1156_v2, %s1101_s22 }
  0x83   : > { %v216_v3 = vpop.permute.xlu0 %215  ;;  %v278_v10 = vpop.permute.xlu1 %277 }
  0x84   : > { %v222_v4 = vsel %vm217_vm1, %v216_v3, 0  ;;  %v285_v11 = vsel %vm283_vm3, %v278_v10, 0 }
  0x85   : > { %982 = vmatpush3.bf16.xpose.msra.mxu0 %v222_v4  ;;  %988 = vmatpush3.bf16.msra.mxu1 %v285_v11 }
  0x86   : > { %999 = vmatprep.subr.bf16.mxu0 %v1098_v0  ;;  %993 = vmatprep.subr.bf16.mxu1 %v1098_v0 }
  0x8c   : > { %984 = vmatmul.mubr.msk.bf16.vlgmr.msra.gmra.mxu0 %vm217_vm1, %v1156_v2 }
  0x8d   : > { %1001 = vmatprep.mubr.msk.bf16.mxu0 %vm1099_vm0, %v1098_v0 }
 0x14c   : > { %v258_v5 = vpop.f32.mrf.mxu0 }
 0x14d   : > { %v265_v6 = vsel %vm264_vm2, %v258_v5, -inf }
 0x14e   : > { %266 = vmax.xlane.f32.xlu0 %v265_v6  ;;  %v985_v7 = vpop.f32.mrf.mxu0 }
 0x150   : > { %v261_v8 = vpop.f32.mrf.mxu0 }
 0x152   : > { %v986_v9 = vpop.f32.mrf.mxu0 }
 0x1d7   : > { %v267_v12 = vpop.xlane.xlu0 %266 }
 0x1d8   : > { %v268_v13 = vsub.f32 %v258_v5, %v267_v12 }
 0x1da   : > { %v269_v14 = vmul.f32 1.442695, %v268_v13 }
 0x1dc   : > { %1074 = vpow2.f32 %v269_v14 }
 0x1e9   : > { %v1075_v15 = vpop.eup %1074 }
 0x1ea   : > { %v271_v16 = vsel %vm264_vm2, %v1075_v15, 0.0 }
 0x1eb   : > { %272 = vadd.xlane.f32.xlu1 %v271_v16 }
 0x1fc   : > { %331 = vrot.lane.b32.xlu1 %v1156_v2, %s1102_s23  ;;  %s209_s23 = scalar_lea.vmem %s1268_s4, %s1150_s17 }
 0x200   : > { %329 = vrot.lane.b32.xlu1 %v1156_v2, %s1103_s24 }
 0x274   : > { %v273_v17 = vpop.xlane.xlu1 %272 }
 0x275   : > { %1076 = vrcp.f32 %v273_v17 }
 0x278   : > { %v332_v19 = vpop.permute.xlu1 %331 }
 0x279   : > { %v337_v21 = vsel %vm217_vm1, %v332_v19, 0 }
 0x27c   : > { %v330_v23 = vpop.permute.xlu1 %329 }
 0x282   : > { %v1077_v18 = vpop.eup %1076 }
 0x283   : > { %v275_v20 = vmul.f32 %v1077_v18, %v1075_v15 }
 0x285   : > { %v276_v22 = vpack.c.bf16 %v275_v20, %v275_v20 }
 0x287   : > { %990 = vmatmul.mubr.msk.bf16.vlgmr.msra.gmra.mxu1 %vm279_vm4, %v276_v22  ;;  %v948_v22 = vld [vmem:[%s1266_s2 + $0x2] sm:$0x1] }
 0x288   : > { %994 = vmatpush3.bf16.xpose.msra.mxu1 %v337_v21  ;;  %995 = vmatprep.mubr.msk.bf16.mxu1 %vm1099_vm0, %v1098_v0 }
 0x289   : > { %1005 = vmatprep.subr.bf16.mxu1 %v1098_v0 }
 0x28f   : > { %996 = vmatmul.mubr.msk.bf16.vlgmr.msra.gmra.mxu1 %vm217_vm1, %v330_v23  ;;  %v652_v23 = vsel %vm445_vm5, %v948_v22, 0 }
 0x290   : > { %1007 = vmatprep.mubr.msk.bf16.mxu1 %vm1099_vm0, %v1098_v0  ;;  %1006 = vmatpush3.bf16.msra.mxu1 %v447_v39 }
 0x291   : > { %1017 = vmatprep.subr.bf16.mxu1 %v1098_v0 }
 0x347   : > { %v321_v24 = vpop.f32.mrf.mxu1 }
 0x348   : > { %v327_v48 = vpack.c.bf16 %v321_v24, %v321_v24 }
 0x349   : > { %v991_v25 = vpop.f32.mrf.mxu1 }
 0x34b   : > { %v324_v26 = vpop.f32.mrf.mxu1 }
 0x34d   : > { %v992_v27 = vpop.f32.mrf.mxu1 }
 0x34f   : > { %v373_v28 = vpop.f32.mrf.mxu1 }
 0x350   : > { %v379_v29 = vsel %vm264_vm2, %v373_v28, -inf }
 0x351   : > { %380 = vmax.xlane.f32.xlu1 %v379_v29  ;;  %v997_v30 = vpop.f32.mrf.mxu1 }
 0x353   : > { %v376_v31 = vpop.f32.mrf.mxu1 }
 0x355   : > { %v998_v32 = vpop.f32.mrf.mxu1 }
 0x3da   : > { %v381_v33 = vpop.xlane.xlu1 %380 }
 0x3db   : > { %v382_v34 = vsub.f32 %v373_v28, %v381_v33 }
 0x3dd   : > { %v383_v35 = vmul.f32 1.442695, %v382_v34 }
 0x3df   : > { %1078 = vpow2.f32 %v383_v35 }
 0x3ec   : > { %v1079_v36 = vpop.eup %1078 }
 0x3ed   : > { %v385_v37 = vsel %vm264_vm2, %v1079_v36, 0.0 }
 0x3ee   : > { %386 = vadd.xlane.f32.xlu0 %v385_v37 }
 0x404   : > { %391 = vrot.lane.b32.xlu0 %v1156_v2, %s1104_s25 }
 0x408   : > { %537 = vrot.lane.b32.xlu0 %v1156_v2, %s1105_s28 }
 0x40c   : > { %535 = vrot.lane.b32.xlu0 %v1156_v2, %s1106_s29 }
 0x477   : > { %v387_v40 = vpop.xlane.xlu0 %386 }
 0x478   : > { %1080 = vrcp.f32 %v387_v40  ;;  %v952_v40 = vld [vmem:[%s1266_s2 + $0x3] sm:$0x1] }
 0x47b   : > { %v392_v41 = vpop.permute.xlu0 %391 }
 0x47c   : > { %v397_v42 = vsel %vm283_vm3, %v392_v41, 0 }
 0x47d   : > { %1000 = vmatpush3.bf16.msra.mxu0 %v397_v42  ;;  %v812_v42 = vsel %vm445_vm5, %v952_v40, 0 }
 0x47e   : > { %1011 = vmatprep.subr.bf16.mxu0 %v1098_v0 }
 0x47f   : > { %v538_v49 = vpop.permute.xlu0 %537 }
 0x480   : > { %v543_v52 = vsel %vm217_vm1, %v538_v49, 0 }
 0x483   : > { %v536_v57 = vpop.permute.xlu0 %535 }
 0x485   : > { %v1081_v43 = vpop.eup %1080 }
 0x486   : > { %v389_v45 = vmul.f32 %v1081_v43, %v1079_v36 }
 0x488   : > { %v390_v46 = vpack.c.bf16 %v389_v45, %v389_v45 }
 0x48a   : > { %1002 = vmatmul.mubr.msk.bf16.vlgmr.msra.gmra.mxu0 %vm279_vm4, %v390_v46 }
 0x48b   : > { %1012 = vmatpush3.bf16.msra.mxu0 %v493_v47  ;;  %1013 = vmatprep.mubr.msk.bf16.mxu0 %vm1099_vm0, %v1098_v0 }
 0x48c   : > { %1023 = vmatprep.subr.bf16.mxu0 %v1098_v0 }
 0x492   : > { %1014 = vmatmul.mubr.msk.bf16.vlgmr.msra.gmra.mxu0 %vm217_vm1, %v327_v48 }
 0x493   : > { %1025 = vmatprep.mubr.msk.bf16.mxu0 %vm1099_vm0, %v1098_v0 }
 0x54a   : > { %v433_v50 = vpop.f32.mrf.mxu0 }
 0x54b   : > { %v439_v51 = vpack.c.bf16 %v433_v50, %v433_v50 }
 0x54c   : > { %v1003_v53 = vpop.f32.mrf.mxu0 }
 0x54d   : > { %1008 = vmatmul.mubr.msk.bf16.vlgmr.msra.gmra.mxu1 %vm217_vm1, %v439_v51 }
 0x54e   : > { %1018 = vmatpush3.bf16.xpose.msra.mxu1 %v543_v52  ;;  %v436_v54 = vpop.f32.mrf.mxu0  ;;  %1019 = vmatprep.mubr.msk.bf16.mxu1 %vm1099_vm0, %v1098_v0 }
 0x54f   : > { %1029 = vmatprep.subr.bf16.mxu1 %v1098_v0 }
 0x550   : > { %v1004_v55 = vpop.f32.mrf.mxu0 }
 0x552   : > { %v1208_v56 = vpop.f32.mrf.mxu0 }
 0x554   : > { %v1015_v58 = vpop.f32.mrf.mxu0 }
 0x555   : > { %1020 = vmatmul.mubr.msk.bf16.vlgmr.msra.gmra.mxu1 %vm217_vm1, %v536_v57 }
 0x556   : > { %v532_v59 = vpop.f32.mrf.mxu0  ;;  %1031 = vmatprep.mubr.msk.bf16.mxu1 %vm1099_vm0, %v1098_v0  ;;  %1030 = vmatpush3.bf16.msra.mxu1 %v652_v23 }
 0x557   : > { %1041 = vmatprep.subr.bf16.mxu1 %v1098_v0  ;;  %v862_v59 = vld [vmem:[%s205_s18] sm:$0xf] }
 0x558   : > { %v1016_v60 = vpop.f32.mrf.mxu0 }
 0x60d   : > { %v1213_v61 = vpop.f32.mrf.mxu1 }
 0x60f   : > { %v1009_v62 = vpop.f32.mrf.mxu1 }
 0x611   : > { %v486_v63 = vpop.f32.mrf.mxu1 }
 0x613   : > { %v1010_v1 = vpop.f32.mrf.mxu1 }
 0x615   : > { %v579_v3 = vpop.f32.mrf.mxu1 }
 0x616   : > { %v585_v4 = vsel %vm264_vm2, %v579_v3, -inf }
 0x617   : > { %586 = vmax.xlane.f32.xlu1 %v585_v4  ;;  %v1021_v5 = vpop.f32.mrf.mxu1 }
 0x619   : > { %v582_v6 = vpop.f32.mrf.mxu1 }
 0x61b   : > { %v1022_v7 = vpop.f32.mrf.mxu1 }
 0x628   : > { %597 = vrot.lane.b32.xlu1 %v1156_v2, %s1107_s6 }
 0x62c   : > { %697 = vrot.lane.b32.xlu1 %v1156_v2, %s1108_s7 }
 0x630   : > { %695 = vrot.lane.b32.xlu1 %v1156_v2, %s1109_s8 }
 0x6a0   : > { %v587_v8 = vpop.xlane.xlu1 %586 }
 0x6a1   : > { %v588_v9 = vsub.f32 %v579_v3, %v587_v8 }
 0x6a3   : > { %v589_v10 = vmul.f32 1.442695, %v588_v9 }
 0x6a4   : > { %v598_v13 = vpop.permute.xlu1 %597 }
 0x6a5   : > { %1082 = vpow2.f32 %v589_v10  ;;  %v603_v14 = vsel %vm283_vm3, %v598_v13, 0 }
 0x6a6   : > { %1024 = vmatpush3.bf16.msra.mxu0 %v603_v14 }
 0x6a7   : > { %1035 = vmatprep.subr.bf16.mxu0 %v1098_v0 }
 0x6a8   : > { %v698_v17 = vpop.permute.xlu1 %697 }
 0x6a9   : > { %v703_v19 = vsel %vm217_vm1, %v698_v17, 0 }
 0x6ac   : > { %v696_v21 = vpop.permute.xlu1 %695 }
 0x6b2   : > { %v1083_v11 = vpop.eup %1082 }
 0x6b3   : > { %v591_v12 = vsel %vm264_vm2, %v1083_v11, 0.0 }
 0x6b4   : > { %592 = vadd.xlane.f32.xlu0 %v591_v12 }
 0x73d   : > { %v593_v15 = vpop.xlane.xlu0 %592 }
 0x73e   : > { %1084 = vrcp.f32 %v593_v15 }
 0x74b   : > { %v1085_v16 = vpop.eup %1084 }
 0x74c   : > { %v595_v18 = vmul.f32 %v1085_v16, %v1083_v11 }
 0x74e   : > { %v596_v20 = vpack.c.bf16 %v595_v18, %v595_v18 }
 0x750   : > { %1026 = vmatmul.mubr.msk.bf16.vlgmr.msra.gmra.mxu0 %vm279_vm4, %v596_v20 }
 0x751   : > { %1036 = vmatpush3.bf16.xpose.msra.mxu0 %v703_v19  ;;  %1037 = vmatprep.mubr.msk.bf16.mxu0 %vm1099_vm0, %v1098_v0 }
 0x752   : > { %1047 = vmatprep.subr.bf16.mxu0 %v1098_v0 }
 0x758   : > { %1038 = vmatmul.mubr.msk.bf16.vlgmr.msra.gmra.mxu0 %vm217_vm1, %v696_v21 }
 0x759   : > { %1049 = vmatprep.mubr.msk.bf16.mxu0 %vm1099_vm0, %v1098_v0  ;;  %1048 = vmatpush3.bf16.msra.mxu0 %v812_v42 }
 0x810   : > { %v639_v24 = vpop.f32.mrf.mxu0 }
 0x811   : > { %v645_v25 = vpack.c.bf16 %v639_v24, %v639_v24 }
 0x812   : > { %v1027_v26 = vpop.f32.mrf.mxu0 }
 0x813   : > { %1032 = vmatmul.mubr.msk.bf16.vlgmr.msra.gmra.mxu1 %vm217_vm1, %v645_v25 }
 0x814   : > { %v642_v27 = vpop.f32.mrf.mxu0  ;;  %1043 = vmatprep.mubr.msk.bf16.mxu1 %vm1099_vm0, %v1098_v0  ;;  %v530_v0 = vadd.f32 %v1208_v56, %v1213_v61  ;;  %v954_v56 = vld [vmem:[%s1267_s3] ss:$0 sm:$0xff] }
 0x816   : > { %v1028_v28 = vpop.f32.mrf.mxu0 }
 0x818   : > { %v739_v29 = vpop.f32.mrf.mxu0 }
 0x819   : > { %v745_v30 = vsel %vm264_vm2, %v739_v29, -inf }
 0x81a   : > { %746 = vmax.xlane.f32.xlu1 %v745_v30  ;;  %v1039_v31 = vpop.f32.mrf.mxu0 }
 0x81c   : > { %v742_v32 = vpop.f32.mrf.mxu0 }
 0x81e   : > { %v1040_v33 = vpop.f32.mrf.mxu0 }
 0x8a3   : > { %v747_v34 = vpop.xlane.xlu1 %746 }
 0x8a4   : > { %v748_v35 = vsub.f32 %v739_v29, %v747_v34 }
 0x8a6   : > { %v749_v36 = vmul.f32 1.442695, %v748_v35 }
 0x8a8   : > { %1086 = vpow2.f32 %v749_v36 }
 0x8b5   : > { %v1087_v37 = vpop.eup %1086 }
 0x8b6   : > { %v751_v38 = vsel %vm264_vm2, %v1087_v37, 0.0 }
 0x8b7   : > { %752 = vadd.xlane.f32.xlu0 %v751_v38 }
 0x8cd   : > { %757 = vrot.lane.b32.xlu0 %v1156_v2, %s1110_s11 }
 0x8d3   : > { %v688_v39 = vpop.f32.mrf.mxu1 }
 0x8d4   : > { %v694_v41 = vadd.f32 %v688_v39, %v530_v0 }
 0x8d5   : > { %v1033_v43 = vpop.f32.mrf.mxu1 }
 0x8d7   : > { %v691_v44 = vpop.f32.mrf.mxu1 }
 0x8d9   : > { %v1034_v45 = vpop.f32.mrf.mxu1 }
 0x940   : > { %v753_v46 = vpop.xlane.xlu0 %752 }
 0x941   : > { %1088 = vrcp.f32 %v753_v46 }
 0x944   : > { %v758_v47 = vpop.permute.xlu0 %757 }
 0x945   : > { %v763_v2 = vsel %vm283_vm3, %v758_v47, 0 }
 0x946   : > { %1042 = vmatpush3.bf16.msra.mxu1 %v763_v2 }
 0x94e   : > { %v1089_v48 = vpop.eup %1088 }
 0x94f   : > { %v755_v49 = vmul.f32 %v1089_v48, %v1087_v37 }
 0x951   : > { %v756_v50 = vpack.c.bf16 %v755_v49, %v755_v49 }
 0x953   : > { %1044 = vmatmul.mubr.msk.bf16.vlgmr.msra.gmra.mxu1 %vm279_vm4, %v756_v50 }
 0xa13   : > { %v799_v51 = vpop.f32.mrf.mxu1 }
 0xa14   : > { %v805_v52 = vpack.c.bf16 %v799_v51, %v799_v51 }
 0xa15   : > { %v1045_v53 = vpop.f32.mrf.mxu1 }
 0xa16   : > { %1050 = vmatmul.mubr.msk.bf16.vlgmr.msra.gmra.mxu0 %vm217_vm1, %v805_v52 }
 0xa17   : > { %v802_v54 = vpop.f32.mrf.mxu1 }
 0xa19   : > { %v1046_v55 = vpop.f32.mrf.mxu1 }
 0xad6   : > { %v848_v57 = vpop.f32.mrf.mxu0 }
 0xad7   : > { %v854_v58 = vadd.f32 %v848_v57, %v694_v41 }
 0xad8   : > { %v1051_v60 = vpop.f32.mrf.mxu0 }
 0xad9   : > { %v861_v61 = vadd.f32 %v954_v56, %v854_v58 }
 0xada   : > { %v851_v62 = vpop.f32.mrf.mxu0 }
 0xadb   : > { %v863_v63 = vadd.f32 %v862_v59, %v861_v61 }
 0xadc   : > { %v1052_v1 = vpop.f32.mrf.mxu0 }
 0xadd   : > { %865 = vst.msk [vmem:[%s209_s23] sm:$0xf] %vm864_vm6, %v863_v63 }
 0xade PF: > { %s14_s15 = sadd.s32 1, %s1096_s15  }
 0xadf   : > { %p11_p4 = scmp.ge.s32.totalorder %s14_s15, 6  }
 0xae1   :  { %13 = sbr.rel (!%p11_p4) target bundleno = 1 (0x1), region = 72 }

</bundles_post_ra>
